<compile_context>
chip_gen: v6e
topology: v6e:2x2x1
jax: 0.10.0
libtpu: 0.0.40
codegen_flags: <defaults>
</compile_context>

<pallas_src>
import functools
import math

import jax
import jax.numpy as jnp
from jax.experimental import pallas as pl
from jax.experimental.pallas import tpu as pltpu

LN_EPS = 1e-5


def _erf(x):
    # Abramowitz & Stegun 7.1.26 polynomial approximation of erf, |err| < 1.5e-7
    # (exp lands on the EUP slot; matches PyTorch's exact-erf GELU within tolerance).
    a1, a2, a3, a4, a5 = 0.254829592, -0.284496736, 1.421413741, -1.453152027, 1.061405429
    p = 0.3275911
    ax = jnp.abs(x)
    t = 1.0 / (1.0 + p * ax)
    poly = ((((a5 * t + a4) * t + a3) * t + a2) * t + a1) * t
    y = 1.0 - poly * jnp.exp(-ax * ax)
    return jnp.where(x >= 0, y, -y)


def _gelu_exact(x):
    # PyTorch nn.GELU() default: exact erf-based GELU.
    return 0.5 * x * (1.0 + _erf(x * (1.0 / math.sqrt(2.0))))


def _layernorm(x, gamma, beta):
    mean = jnp.mean(x, axis=-1, keepdims=True)
    var = jnp.mean((x - mean) ** 2, axis=-1, keepdims=True)
    return (x - mean) * jax.lax.rsqrt(var + LN_EPS) * gamma + beta


def encoder_layer_kernel(
    x_ref, bias_ref,
    ln1_g, ln1_b, wqkv, bqkv, wo3, bo,
    ln2_g, ln2_b, w1, b1, w2, b2,
    out_ref,
    q_s, k_s, v_s,
    *, num_heads,
):
    S = x_ref.shape[1]
    H = x_ref.shape[2]
    tq = out_ref.shape[1]
    dk = H // num_heads
    md = wqkv.dtype                     # matmul operand dtype (bf16 or f32)

    qi = pl.program_id(1)

    # ---- once per batch element: LN1 + fused Q/K/V projection for the full sequence ----
    @pl.when(qi == 0)
    def _():
        xf = x_ref[0].astype(jnp.float32)                                 # (S, H)
        yf = _layernorm(xf, ln1_g[0], ln1_b[0])
        # softmax scale already folded into the Q columns of wqkv / bqkv (wrapper)
        qkv = jnp.dot(yf.astype(md), wqkv[...],
                      preferred_element_type=jnp.float32) + bqkv[0]       # (S, 3H)
        for h in range(num_heads):
            lo = h * dk
            hi = (h + 1) * dk
            q_s[h] = qkv[:, lo:hi].astype(q_s.dtype)                      # f32, sliceable
            k_s[h] = qkv[:, H + lo:H + hi].astype(k_s.dtype)
            v_s[h] = qkv[:, 2 * H + lo:2 * H + hi].astype(v_s.dtype)

    # ---- per query tile ----
    q_start = pl.multiple_of(qi * tq, tq)
    x_q = x_ref[0, pl.ds(q_start, tq), :].astype(jnp.float32)             # (tq, H)

    # --- self-attention block ---
    q3 = q_s[:, pl.ds(q_start, tq), :].astype(md)                         # (nh, tq, dk)
    k3 = k_s[...]                                                         # (nh, S,  dk)
    v3 = v_s[...]                                                         # (nh, S,  dk)

    # head-batched scores, contraction on the last dim (no explicit K transpose)
    s = jnp.einsum("hqd,hkd->hqk", q3, k3,
                   preferred_element_type=jnp.float32)                    # (nh, tq, S)
    s = s + bias_ref[0]
    s = s - jnp.max(s, axis=-1, keepdims=True)                            # stable softmax (dim=3)
    p = jnp.exp(s)
    p = p * pl.reciprocal(jnp.sum(p, axis=-1, keepdims=True))
    # attention dropout: identity (eval)

    o3 = jnp.einsum("hqk,hkd->hqd", p.astype(md), v3,
                    preferred_element_type=jnp.float32)                   # (nh, tq, dk)
    # output projection as a head-batched matmul + sum over heads
    # (avoids lane-dim concatenate of per-head outputs)
    per_head = jnp.einsum("hqd,hde->hqe", o3.astype(md), wo3[...],
                          preferred_element_type=jnp.float32)             # (nh, tq, H)
    attn = jnp.sum(per_head, axis=0) + bo[0]                              # (tq, H)
    # self_attention_dropout: identity (eval)

    x1 = x_q + attn

    # --- feed-forward block ---
    y2 = _layernorm(x1, ln2_g[0], ln2_b[0])
    h1 = jnp.dot(y2.astype(md), w1[...],
                 preferred_element_type=jnp.float32) + b1[0]
    g = _gelu_exact(h1)
    ffn = jnp.dot(g.astype(md), w2[...],
                  preferred_element_type=jnp.float32) + b2[0]
    # ffn_dropout: identity (eval)

    out_ref[0] = (x1 + ffn).astype(out_ref.dtype)


def encoder_layer(x, attn_bias, params, num_heads, *, q_block=None,
                  matmul_dtype=jnp.bfloat16):
    B, S, H = x.shape
    nh = num_heads
    assert H % nh == 0, "hidden_size must be divisible by num_heads"
    dk = H // nh
    scale = dk ** (-0.5)

    # Pick a query-block size: must divide S and be a multiple of 8 (or equal S).
    if q_block is None:
        if S <= 256 or S % 8 != 0:
            q_block = S
        else:
            q_block = S
            for t in range(256, 7, -8):
                if S % t == 0:
                    q_block = t
                    break
    tq = q_block
    assert tq == S or (S % tq == 0 and tq % 8 == 0), \
        "q_block must divide S and be a multiple of 8 (or equal S)"
    nq = S // tq

    md = matmul_dtype
    f32 = jnp.float32

    # --- one-time weight preprocessing (host side) ---
    # Fused QKV weight with the softmax scale folded into the Q columns.
    wqkv = jnp.concatenate(
        [params["wq"] * scale, params["wk"], params["wv"]], axis=1).astype(md)   # (H, 3H)
    bqkv = jnp.concatenate(
        [params["bq"] * scale, params["bk"], params["bv"]], axis=1).astype(f32)  # (1, 3H)
    wo3 = params["wo"].reshape(nh, dk, H).astype(md)            # (nh, dk, H) head-major rows

    plist = [
        params["ln1_g"].astype(f32), params["ln1_b"].astype(f32),
        wqkv, bqkv, wo3, params["bo"].astype(f32),
        params["ln2_g"].astype(f32), params["ln2_b"].astype(f32),
        params["w1"].astype(md), params["b1"].astype(f32),
        params["w2"].astype(md), params["b2"].astype(f32),
    ]
    # TODO(synk): for production sizes (H~4096, F~16384, S~2048) w1/w2 and the Q/K/V
    # scratch cannot stay whole in VMEM; stream FFN weights over a trailing
    # "arbitrary" reduction grid axis with an f32 accumulator, and tile K/V
    # flash-style (online softmax over kv blocks).

    param_specs = [
        pl.BlockSpec(p.shape, lambda b, q, nd=p.ndim: (0,) * nd) for p in plist
    ]

    kernel = functools.partial(encoder_layer_kernel, num_heads=nh)

    return pl.pallas_call(
        kernel,
        out_shape=jax.ShapeDtypeStruct((B, S, H), x.dtype),
        grid_spec=pltpu.PrefetchScalarGridSpec(
            num_scalar_prefetch=0,
            grid=(B, nq),
            in_specs=[
                # x stays resident per batch element (same block across query steps)
                pl.BlockSpec((1, S, H), lambda b, q: (b, 0, 0)),
                # attention bias sliced per query block -- avoids the (1,nh,S,S) VMEM blowup
                pl.BlockSpec((1, nh, tq, S), lambda b, q: (b, 0, q, 0)),
            ] + param_specs,
            out_specs=pl.BlockSpec((1, tq, H), lambda b, q: (b, q, 0)),
            scratch_shapes=[
                pltpu.VMEM((nh, S, dk), f32),   # Q (all heads), f32 -> clean 8-aligned slices
                pltpu.VMEM((nh, S, dk), md),    # K (all heads), persists across query tiles
                pltpu.VMEM((nh, S, dk), md),    # V (all heads), persists across query tiles
            ],
        ),
        compiler_params=pltpu.CompilerParams(
            dimension_semantics=("parallel", "arbitrary"),
            vmem_limit_bytes=48 * 1024 * 1024,   # < 64 MiB physical VMEM on v7x
        ),
    )(x, attn_bias, *plist)


# -------------------- pure-JAX reference (for sanity check) --------------------
def ref_encoder_layer(x, attn_bias, params, num_heads):
    def ln(z, g, b):
        m = jnp.mean(z, axis=-1, keepdims=True)
        v = jnp.mean((z - m) ** 2, axis=-1, keepdims=True)
        return (z - m) / jnp.sqrt(v + LN_EPS) * g + b

    B, S, H = x.shape
    dk = H // num_heads
    scale = dk ** (-0.5)

    y = ln(x, params["ln1_g"][0], params["ln1_b"][0])
    q = y @ params["wq"] + params["bq"][0]
    k = y @ params["wk"] + params["bk"][0]
    v = y @ params["wv"] + params["bv"][0]
    q = q.reshape(B, S, num_heads, dk).transpose(0, 2, 1, 3) * scale
    k = k.reshape(B, S, num_heads, dk).transpose(0, 2, 1, 3)
    v = v.reshape(B, S, num_heads, dk).transpose(0, 2, 1, 3)
    s = jnp.einsum("bhqd,bhkd->bhqk", q, k) + attn_bias
    p = jax.nn.softmax(s, axis=-1)
    a = jnp.einsum("bhqk,bhkd->bhqd", p, v).transpose(0, 2, 1, 3).reshape(B, S, H)
    a = a @ params["wo"] + params["bo"][0]
    x = x + a

    y = ln(x, params["ln2_g"][0], params["ln2_b"][0])
    y = y @ params["w1"] + params["b1"][0]
    y = jax.nn.gelu(y, approximate=False)
    y = y @ params["w2"] + params["b2"][0]
    return x + y


if __name__ == "__main__":
    B, S, H, F, NH = 2, 16, 32, 64, 4

    key = jax.random.PRNGKey(0)
    keys = jax.random.split(key, 16)

    def norm(k, shape, s=0.02):
        return jax.random.normal(k, shape, jnp.float32) * s

    # Weights stored as (in_features, out_features)  (i.e. PyTorch weight.T).
    # 1-D params stored as (1, dim) for TPU-friendly 2-D layout.
    params = {
        "ln1_g": jnp.ones((1, H), jnp.float32),
        "ln1_b": jnp.zeros((1, H), jnp.float32),
        "wq": norm(keys[0], (H, H)), "bq": norm(keys[1], (1, H)),
        "wk": norm(keys[2], (H, H)), "bk": norm(keys[3], (1, H)),
        "wv": norm(keys[4], (H, H)), "bv": norm(keys[5], (1, H)),
        "wo": norm(keys[6], (H, H)), "bo": norm(keys[7], (1, H)),
        "ln2_g": jnp.ones((1, H), jnp.float32),
        "ln2_b": jnp.zeros((1, H), jnp.float32),
        "w1": norm(keys[8], (H, F)), "b1": norm(keys[9], (1, F)),
        "w2": norm(keys[10], (F, H)), "b2": norm(keys[11], (1, H)),
    }

    x = jax.random.normal(keys[12], (B, S, H), jnp.float32)
    attn_bias = jax.random.normal(keys[13], (B, NH, S, S), jnp.float32) * 0.1

    ref = ref_encoder_layer(x, attn_bias, params, NH)

    # 1) f32-matmul path (exercises query tiling with tq=8, nq=2) -- tight tolerance
    out_f32 = encoder_layer(x, attn_bias, params, NH, q_block=8,
                            matmul_dtype=jnp.float32)
    out_f32 = jax.block_until_ready(out_f32)
    assert out_f32.shape == (B, S, H)
    assert bool(jnp.all(jnp.isfinite(out_f32)))
    assert bool(jnp.allclose(out_f32, ref, atol=1e-3, rtol=1e-3)), \
        f"f32 max abs diff = {float(jnp.max(jnp.abs(out_f32 - ref)))}"

    # 2) default bf16-MXU path (f32 accumulation) -- looser tolerance
    out_bf16 = encoder_layer(x, attn_bias, params, NH, q_block=8)
    out_bf16 = jax.block_until_ready(out_bf16)
    assert out_bf16.shape == (B, S, H)
    assert bool(jnp.all(jnp.isfinite(out_bf16)))
    assert bool(jnp.allclose(out_bf16, ref, atol=3e-2, rtol=3e-2)), \
        f"bf16 max abs diff = {float(jnp.max(jnp.abs(out_bf16 - ref)))}"

    print("KERNEL_OK")
</pallas_src>

<mosaic_0001>
module attributes {stable_mosaic.version = 11 : i64} {
  func.func @encoder_layer_kernel(%arg0: i32, %arg1: i32, %arg2: memref<1x16x32xf32, #tpu.memory_space<vmem>>, %arg3: memref<1x4x8x16xf32, #tpu.memory_space<vmem>>, %arg4: memref<1x32xf32, #tpu.memory_space<vmem>>, %arg5: memref<1x32xf32, #tpu.memory_space<vmem>>, %arg6: memref<32x96xf32, #tpu.memory_space<vmem>>, %arg7: memref<1x96xf32, #tpu.memory_space<vmem>>, %arg8: memref<4x8x32xf32, #tpu.memory_space<vmem>>, %arg9: memref<1x32xf32, #tpu.memory_space<vmem>>, %arg10: memref<1x32xf32, #tpu.memory_space<vmem>>, %arg11: memref<1x32xf32, #tpu.memory_space<vmem>>, %arg12: memref<32x64xf32, #tpu.memory_space<vmem>>, %arg13: memref<1x64xf32, #tpu.memory_space<vmem>>, %arg14: memref<64x32xf32, #tpu.memory_space<vmem>>, %arg15: memref<1x32xf32, #tpu.memory_space<vmem>>, %arg16: memref<1x8x32xf32, #tpu.memory_space<vmem>>, %arg17: memref<4x16x8xf32, #tpu.memory_space<vmem>>, %arg18: memref<4x16x8xf32, #tpu.memory_space<vmem>>, %arg19: memref<4x16x8xf32, #tpu.memory_space<vmem>>) attributes {dimension_semantics = [#tpu.dimension_semantics<parallel>, #tpu.dimension_semantics<arbitrary>], iteration_bounds = array<i64: 2, 2>, scalar_prefetch = 0 : i64, scratch_operands = 3 : i64, tpu.core_type = #tpu.core_type<tc>, window_params = [{transform_indices = @transform_0, window_bounds = array<i64: 1, 16, 32>}, {transform_indices = @transform_1, window_bounds = array<i64: 1, 4, 8, 16>}, {pipeline_mode = #tpu.pipeline_mode<synchronous>, transform_indices = @transform_2, window_bounds = array<i64: 1, 32>}, {pipeline_mode = #tpu.pipeline_mode<synchronous>, transform_indices = @transform_3, window_bounds = array<i64: 1, 32>}, {pipeline_mode = #tpu.pipeline_mode<synchronous>, transform_indices = @transform_4, window_bounds = array<i64: 32, 96>}, {pipeline_mode = #tpu.pipeline_mode<synchronous>, transform_indices = @transform_5, window_bounds = array<i64: 1, 96>}, {pipeline_mode = #tpu.pipeline_mode<synchronous>, transform_indices = @transform_6, window_bounds = array<i64: 4, 8, 32>}, {pipeline_mode = #tpu.pipeline_mode<synchronous>, transform_indices = @transform_7, window_bounds = array<i64: 1, 32>}, {pipeline_mode = #tpu.pipeline_mode<synchronous>, transform_indices = @transform_8, window_bounds = array<i64: 1, 32>}, {pipeline_mode = #tpu.pipeline_mode<synchronous>, transform_indices = @transform_9, window_bounds = array<i64: 1, 32>}, {pipeline_mode = #tpu.pipeline_mode<synchronous>, transform_indices = @transform_10, window_bounds = array<i64: 32, 64>}, {pipeline_mode = #tpu.pipeline_mode<synchronous>, transform_indices = @transform_11, window_bounds = array<i64: 1, 64>}, {pipeline_mode = #tpu.pipeline_mode<synchronous>, transform_indices = @transform_12, window_bounds = array<i64: 64, 32>}, {pipeline_mode = #tpu.pipeline_mode<synchronous>, transform_indices = @transform_13, window_bounds = array<i64: 1, 32>}, {transform_indices = @transform_14, window_bounds = array<i64: 1, 8, 32>}]} {
    %c0_i32 = arith.constant 0 : i32
    %0 = arith.cmpi eq, %arg1, %c0_i32 : i32
    %1 = arith.extui %0 : i1 to i32
    %c0_i32_0 = arith.constant 0 : i32
    %2 = arith.cmpi ne, %1, %c0_i32_0 : i32
    scf.if %2 {
      %c0_61 = arith.constant 0 : index
      %c0_62 = arith.constant 0 : index
      %c0_63 = arith.constant 0 : index
      %122 = vector.load %arg2[%c0_61, %c0_62, %c0_63] : memref<1x16x32xf32, #tpu.memory_space<vmem>>, vector<1x16x32xf32>
      %123 = vector.shape_cast %122 : vector<1x16x32xf32> to vector<16x32xf32>
      %c0_64 = arith.constant 0 : index
      %c0_65 = arith.constant 0 : index
      %124 = vector.load %arg4[%c0_64, %c0_65] : memref<1x32xf32, #tpu.memory_space<vmem>>, vector<1x32xf32>
      %125 = vector.shape_cast %124 : vector<1x32xf32> to vector<32xf32>
      %c0_66 = arith.constant 0 : index
      %c0_67 = arith.constant 0 : index
      %126 = vector.load %arg5[%c0_66, %c0_67] : memref<1x32xf32, #tpu.memory_space<vmem>>, vector<1x32xf32>
      %127 = vector.shape_cast %126 : vector<1x32xf32> to vector<32xf32>
      %cst_68 = arith.constant dense<0.000000e+00> : vector<16xf32>
      %128 = vector.multi_reduction <add>, %123, %cst_68 [1] : vector<16x32xf32> to vector<16xf32>
      %129 = vector.shape_cast %128 : vector<16xf32> to vector<16x1xf32>
      %cst_69 = arith.constant 3.200000e+01 : f32
      %130 = vector.broadcast %cst_69 : f32 to vector<16x1xf32>
      %131 = arith.divf %129, %130 : vector<16x1xf32>
      %132 = vector.broadcast %131 : vector<16x1xf32> to vector<16x32xf32>
      %133 = arith.subf %123, %132 : vector<16x32xf32>
      %134 = arith.mulf %133, %133 : vector<16x32xf32>
      %cst_70 = arith.constant dense<0.000000e+00> : vector<16xf32>
      %135 = vector.multi_reduction <add>, %134, %cst_70 [1] : vector<16x32xf32> to vector<16xf32>
      %136 = vector.shape_cast %135 : vector<16xf32> to vector<16x1xf32>
      %cst_71 = arith.constant 3.200000e+01 : f32
      %137 = vector.broadcast %cst_71 : f32 to vector<16x1xf32>
      %138 = arith.divf %136, %137 : vector<16x1xf32>
      %139 = vector.broadcast %131 : vector<16x1xf32> to vector<16x32xf32>
      %140 = arith.subf %123, %139 : vector<16x32xf32>
      %cst_72 = arith.constant 9.99999974E-6 : f32
      %141 = vector.broadcast %cst_72 : f32 to vector<16x1xf32>
      %142 = arith.addf %138, %141 : vector<16x1xf32>
      %143 = math.rsqrt %142 : vector<16x1xf32>
      %144 = vector.broadcast %143 : vector<16x1xf32> to vector<16x32xf32>
      %145 = arith.mulf %140, %144 : vector<16x32xf32>
      %146 = vector.shape_cast %125 : vector<32xf32> to vector<1x32xf32>
      %147 = vector.broadcast %146 : vector<1x32xf32> to vector<16x32xf32>
      %148 = arith.mulf %145, %147 : vector<16x32xf32>
      %149 = vector.shape_cast %127 : vector<32xf32> to vector<1x32xf32>
      %150 = vector.broadcast %149 : vector<1x32xf32> to vector<16x32xf32>
      %151 = arith.addf %148, %150 : vector<16x32xf32>
      %c0_73 = arith.constant 0 : index
      %c0_74 = arith.constant 0 : index
      %152 = vector.load %arg6[%c0_73, %c0_74] : memref<32x96xf32, #tpu.memory_space<vmem>>, vector<32x96xf32>
      %cst_75 = arith.constant dense<0.000000e+00> : vector<16x96xf32>
      %153 = tpu.matmul %151, %152, %cst_75 {dimension_numbers = #tpu.dot_dimension_numbers<[1], [0], [0], [1], [0, 0, 1, 1], [], []>} : vector<16x32xf32>, vector<32x96xf32>, vector<16x96xf32> -> vector<16x96xf32>
      %c0_76 = arith.constant 0 : index
      %c0_77 = arith.constant 0 : index
      %154 = vector.load %arg7[%c0_76, %c0_77] : memref<1x96xf32, #tpu.memory_space<vmem>>, vector<1x96xf32>
      %155 = vector.shape_cast %154 : vector<1x96xf32> to vector<96xf32>
      %156 = vector.shape_cast %155 : vector<96xf32> to vector<1x96xf32>
      %157 = vector.broadcast %156 : vector<1x96xf32> to vector<16x96xf32>
      %158 = arith.addf %153, %157 : vector<16x96xf32>
      %159 = vector.extract_strided_slice %158 {offsets = [0, 0], sizes = [16, 8], strides = [1, 1]} : vector<16x96xf32> to vector<16x8xf32>
      %c0_78 = arith.constant 0 : index
      %c0_79 = arith.constant 0 : index
      %c0_80 = arith.constant 0 : index
      %160 = vector.load %arg17[%c0_78, %c0_79, %c0_80] : memref<4x16x8xf32, #tpu.memory_space<vmem>>, vector<1x16x8xf32>
      %161 = vector.shape_cast %160 : vector<1x16x8xf32> to vector<16x8xf32>
      %162 = vector.shape_cast %159 : vector<16x8xf32> to vector<1x16x8xf32>
      tpu.vector_store %arg17[%c0_78, %c0_79, %c0_80], %162 {strides = array<i32>} : memref<4x16x8xf32, #tpu.memory_space<vmem>>, vector<1x16x8xf32>,
      %163 = vector.extract_strided_slice %158 {offsets = [0, 32], sizes = [16, 8], strides = [1, 1]} : vector<16x96xf32> to vector<16x8xf32>
      %c0_81 = arith.constant 0 : index
      %c0_82 = arith.constant 0 : index
      %c0_83 = arith.constant 0 : index
      %164 = vector.load %arg18[%c0_81, %c0_82, %c0_83] : memref<4x16x8xf32, #tpu.memory_space<vmem>>, vector<1x16x8xf32>
      %165 = vector.shape_cast %164 : vector<1x16x8xf32> to vector<16x8xf32>
      %166 = vector.shape_cast %163 : vector<16x8xf32> to vector<1x16x8xf32>
      tpu.vector_store %arg18[%c0_81, %c0_82, %c0_83], %166 {strides = array<i32>} : memref<4x16x8xf32, #tpu.memory_space<vmem>>, vector<1x16x8xf32>,
      %167 = vector.extract_strided_slice %158 {offsets = [0, 64], sizes = [16, 8], strides = [1, 1]} : vector<16x96xf32> to vector<16x8xf32>
      %c0_84 = arith.constant 0 : index
      %c0_85 = arith.constant 0 : index
      %c0_86 = arith.constant 0 : index
      %168 = vector.load %arg19[%c0_84, %c0_85, %c0_86] : memref<4x16x8xf32, #tpu.memory_space<vmem>>, vector<1x16x8xf32>
      %169 = vector.shape_cast %168 : vector<1x16x8xf32> to vector<16x8xf32>
      %170 = vector.shape_cast %167 : vector<16x8xf32> to vector<1x16x8xf32>
      tpu.vector_store %arg19[%c0_84, %c0_85, %c0_86], %170 {strides = array<i32>} : memref<4x16x8xf32, #tpu.memory_space<vmem>>, vector<1x16x8xf32>,
      %171 = vector.extract_strided_slice %158 {offsets = [0, 8], sizes = [16, 8], strides = [1, 1]} : vector<16x96xf32> to vector<16x8xf32>
      %c1 = arith.constant 1 : index
      %c0_87 = arith.constant 0 : index
      %c0_88 = arith.constant 0 : index
      %172 = vector.load %arg17[%c1, %c0_87, %c0_88] : memref<4x16x8xf32, #tpu.memory_space<vmem>>, vector<1x16x8xf32>
      %173 = vector.shape_cast %172 : vector<1x16x8xf32> to vector<16x8xf32>
      %174 = vector.shape_cast %171 : vector<16x8xf32> to vector<1x16x8xf32>
      tpu.vector_store %arg17[%c1, %c0_87, %c0_88], %174 {strides = array<i32>} : memref<4x16x8xf32, #tpu.memory_space<vmem>>, vector<1x16x8xf32>,
      %175 = vector.extract_strided_slice %158 {offsets = [0, 40], sizes = [16, 8], strides = [1, 1]} : vector<16x96xf32> to vector<16x8xf32>
      %c1_89 = arith.constant 1 : index
      %c0_90 = arith.constant 0 : index
      %c0_91 = arith.constant 0 : index
      %176 = vector.load %arg18[%c1_89, %c0_90, %c0_91] : memref<4x16x8xf32, #tpu.memory_space<vmem>>, vector<1x16x8xf32>
      %177 = vector.shape_cast %176 : vector<1x16x8xf32> to vector<16x8xf32>
      %178 = vector.shape_cast %175 : vector<16x8xf32> to vector<1x16x8xf32>
      tpu.vector_store %arg18[%c1_89, %c0_90, %c0_91], %178 {strides = array<i32>} : memref<4x16x8xf32, #tpu.memory_space<vmem>>, vector<1x16x8xf32>,
      %179 = vector.extract_strided_slice %158 {offsets = [0, 72], sizes = [16, 8], strides = [1, 1]} : vector<16x96xf32> to vector<16x8xf32>
      %c1_92 = arith.constant 1 : index
      %c0_93 = arith.constant 0 : index
      %c0_94 = arith.constant 0 : index
      %180 = vector.load %arg19[%c1_92, %c0_93, %c0_94] : memref<4x16x8xf32, #tpu.memory_space<vmem>>, vector<1x16x8xf32>
      %181 = vector.shape_cast %180 : vector<1x16x8xf32> to vector<16x8xf32>
      %182 = vector.shape_cast %179 : vector<16x8xf32> to vector<1x16x8xf32>
      tpu.vector_store %arg19[%c1_92, %c0_93, %c0_94], %182 {strides = array<i32>} : memref<4x16x8xf32, #tpu.memory_space<vmem>>, vector<1x16x8xf32>,
      %183 = vector.extract_strided_slice %158 {offsets = [0, 16], sizes = [16, 8], strides = [1, 1]} : vector<16x96xf32> to vector<16x8xf32>
      %c2 = arith.constant 2 : index
      %c0_95 = arith.constant 0 : index
      %c0_96 = arith.constant 0 : index
      %184 = vector.load %arg17[%c2, %c0_95, %c0_96] : memref<4x16x8xf32, #tpu.memory_space<vmem>>, vector<1x16x8xf32>
      %185 = vector.shape_cast %184 : vector<1x16x8xf32> to vector<16x8xf32>
      %186 = vector.shape_cast %183 : vector<16x8xf32> to vector<1x16x8xf32>
      tpu.vector_store %arg17[%c2, %c0_95, %c0_96], %186 {strides = array<i32>} : memref<4x16x8xf32, #tpu.memory_space<vmem>>, vector<1x16x8xf32>,
      %187 = vector.extract_strided_slice %158 {offsets = [0, 48], sizes = [16, 8], strides = [1, 1]} : vector<16x96xf32> to vector<16x8xf32>
      %c2_97 = arith.constant 2 : index
      %c0_98 = arith.constant 0 : index
      %c0_99 = arith.constant 0 : index
      %188 = vector.load %arg18[%c2_97, %c0_98, %c0_99] : memref<4x16x8xf32, #tpu.memory_space<vmem>>, vector<1x16x8xf32>
      %189 = vector.shape_cast %188 : vector<1x16x8xf32> to vector<16x8xf32>
      %190 = vector.shape_cast %187 : vector<16x8xf32> to vector<1x16x8xf32>
      tpu.vector_store %arg18[%c2_97, %c0_98, %c0_99], %190 {strides = array<i32>} : memref<4x16x8xf32, #tpu.memory_space<vmem>>, vector<1x16x8xf32>,
      %191 = vector.extract_strided_slice %158 {offsets = [0, 80], sizes = [16, 8], strides = [1, 1]} : vector<16x96xf32> to vector<16x8xf32>
      %c2_100 = arith.constant 2 : index
      %c0_101 = arith.constant 0 : index
      %c0_102 = arith.constant 0 : index
      %192 = vector.load %arg19[%c2_100, %c0_101, %c0_102] : memref<4x16x8xf32, #tpu.memory_space<vmem>>, vector<1x16x8xf32>
      %193 = vector.shape_cast %192 : vector<1x16x8xf32> to vector<16x8xf32>
      %194 = vector.shape_cast %191 : vector<16x8xf32> to vector<1x16x8xf32>
      tpu.vector_store %arg19[%c2_100, %c0_101, %c0_102], %194 {strides = array<i32>} : memref<4x16x8xf32, #tpu.memory_space<vmem>>, vector<1x16x8xf32>,
      %195 = vector.extract_strided_slice %158 {offsets = [0, 24], sizes = [16, 8], strides = [1, 1]} : vector<16x96xf32> to vector<16x8xf32>
      %c3 = arith.constant 3 : index
      %c0_103 = arith.constant 0 : index
      %c0_104 = arith.constant 0 : index
      %196 = vector.load %arg17[%c3, %c0_103, %c0_104] : memref<4x16x8xf32, #tpu.memory_space<vmem>>, vector<1x16x8xf32>
      %197 = vector.shape_cast %196 : vector<1x16x8xf32> to vector<16x8xf32>
      %198 = vector.shape_cast %195 : vector<16x8xf32> to vector<1x16x8xf32>
      tpu.vector_store %arg17[%c3, %c0_103, %c0_104], %198 {strides = array<i32>} : memref<4x16x8xf32, #tpu.memory_space<vmem>>, vector<1x16x8xf32>,
      %199 = vector.extract_strided_slice %158 {offsets = [0, 56], sizes = [16, 8], strides = [1, 1]} : vector<16x96xf32> to vector<16x8xf32>
      %c3_105 = arith.constant 3 : index
      %c0_106 = arith.constant 0 : index
      %c0_107 = arith.constant 0 : index
      %200 = vector.load %arg18[%c3_105, %c0_106, %c0_107] : memref<4x16x8xf32, #tpu.memory_space<vmem>>, vector<1x16x8xf32>
      %201 = vector.shape_cast %200 : vector<1x16x8xf32> to vector<16x8xf32>
      %202 = vector.shape_cast %199 : vector<16x8xf32> to vector<1x16x8xf32>
      tpu.vector_store %arg18[%c3_105, %c0_106, %c0_107], %202 {strides = array<i32>} : memref<4x16x8xf32, #tpu.memory_space<vmem>>, vector<1x16x8xf32>,
      %203 = vector.extract_strided_slice %158 {offsets = [0, 88], sizes = [16, 8], strides = [1, 1]} : vector<16x96xf32> to vector<16x8xf32>
      %c3_108 = arith.constant 3 : index
      %c0_109 = arith.constant 0 : index
      %c0_110 = arith.constant 0 : index
      %204 = vector.load %arg19[%c3_108, %c0_109, %c0_110] : memref<4x16x8xf32, #tpu.memory_space<vmem>>, vector<1x16x8xf32>
      %205 = vector.shape_cast %204 : vector<1x16x8xf32> to vector<16x8xf32>
      %206 = vector.shape_cast %203 : vector<16x8xf32> to vector<1x16x8xf32>
      tpu.vector_store %arg19[%c3_108, %c0_109, %c0_110], %206 {strides = array<i32>} : memref<4x16x8xf32, #tpu.memory_space<vmem>>, vector<1x16x8xf32>,
    } else {
    }
    %c8_i32 = arith.constant 8 : i32
    %3 = arith.muli %arg1, %c8_i32 : i32
    %4 = tpu.assume_multiple %3, 8 : i32
    %c0 = arith.constant 0 : index
    %5 = arith.index_cast %4 : i32 to index
    %c0_1 = arith.constant 0 : index
    %6 = vector.load %arg2[%c0, %5, %c0_1] : memref<1x16x32xf32, #tpu.memory_space<vmem>>, vector<1x8x32xf32>
    %7 = vector.shape_cast %6 : vector<1x8x32xf32> to vector<8x32xf32>
    %c0_2 = arith.constant 0 : index
    %8 = arith.index_cast %4 : i32 to index
    %c0_3 = arith.constant 0 : index
    %9 = vector.load %arg17[%c0_2, %8, %c0_3] : memref<4x16x8xf32, #tpu.memory_space<vmem>>, vector<4x8x8xf32>
    %c0_4 = arith.constant 0 : index
    %c0_5 = arith.constant 0 : index
    %c0_6 = arith.constant 0 : index
    %10 = vector.load %arg18[%c0_4, %c0_5, %c0_6] : memref<4x16x8xf32, #tpu.memory_space<vmem>>, vector<4x16x8xf32>
    %c0_7 = arith.constant 0 : index
    %c0_8 = arith.constant 0 : index
    %c0_9 = arith.constant 0 : index
    %11 = vector.load %arg19[%c0_7, %c0_8, %c0_9] : memref<4x16x8xf32, #tpu.memory_space<vmem>>, vector<4x16x8xf32>
    "tpu.trace_start"() <{level = 10 : i32, message = "hqd,hkd->hqk"}> : () -> ()
    %cst = arith.constant dense<0.000000e+00> : vector<4x8x16xf32>
    %12 = tpu.matmul %9, %10, %cst {dimension_numbers = #tpu.dot_dimension_numbers<[2], [2], [1], [1], [0, 0, 0, 1, 1, 1], [0], [0]>} : vector<4x8x8xf32>, vector<4x16x8xf32>, vector<4x8x16xf32> -> vector<4x8x16xf32>
    "tpu.trace_stop"() : () -> ()
    %c0_10 = arith.constant 0 : index
    %c0_11 = arith.constant 0 : index
    %c0_12 = arith.constant 0 : index
    %c0_13 = arith.constant 0 : index
    %13 = vector.load %arg3[%c0_10, %c0_11, %c0_12, %c0_13] : memref<1x4x8x16xf32, #tpu.memory_space<vmem>>, vector<1x4x8x16xf32>
    %14 = vector.shape_cast %13 : vector<1x4x8x16xf32> to vector<4x8x16xf32>
    %15 = arith.addf %12, %14 : vector<4x8x16xf32>
    %cst_14 = arith.constant dense<0xFF800000> : vector<4x8xf32>
    %16 = vector.multi_reduction <maximumf>, %15, %cst_14 [2] : vector<4x8x16xf32> to vector<4x8xf32>
    %17 = vector.shape_cast %16 : vector<4x8xf32> to vector<4x8x1xf32>
    %18 = vector.broadcast %17 : vector<4x8x1xf32> to vector<4x8x16xf32>
    %19 = arith.subf %15, %18 : vector<4x8x16xf32>
    %20 = math.exp %19 : vector<4x8x16xf32>
    %cst_15 = arith.constant dense<0.000000e+00> : vector<4x8xf32>
    %21 = vector.multi_reduction <add>, %20, %cst_15 [2] : vector<4x8x16xf32> to vector<4x8xf32>
    %22 = vector.shape_cast %21 : vector<4x8xf32> to vector<4x8x1xf32>
    %23 = tpu.reciprocal %22 : vector<4x8x1xf32> -> vector<4x8x1xf32>
    %24 = vector.broadcast %23 : vector<4x8x1xf32> to vector<4x8x16xf32>
    %25 = arith.mulf %20, %24 : vector<4x8x16xf32>
    "tpu.trace_start"() <{level = 10 : i32, message = "hqk,hkd->hqd"}> : () -> ()
    %cst_16 = arith.constant dense<0.000000e+00> : vector<4x8x8xf32>
    %26 = tpu.matmul %25, %11, %cst_16 {dimension_numbers = #tpu.dot_dimension_numbers<[2], [1], [1], [2], [0, 0, 0, 1, 1, 2], [0], [0]>} : vector<4x8x16xf32>, vector<4x16x8xf32>, vector<4x8x8xf32> -> vector<4x8x8xf32>
    "tpu.trace_stop"() : () -> ()
    %c0_17 = arith.constant 0 : index
    %c0_18 = arith.constant 0 : index
    %c0_19 = arith.constant 0 : index
    %27 = vector.load %arg8[%c0_17, %c0_18, %c0_19] : memref<4x8x32xf32, #tpu.memory_space<vmem>>, vector<4x8x32xf32>
    "tpu.trace_start"() <{level = 10 : i32, message = "hqd,hde->hqe"}> : () -> ()
    %cst_20 = arith.constant dense<0.000000e+00> : vector<4x8x32xf32>
    %28 = tpu.matmul %26, %27, %cst_20 {dimension_numbers = #tpu.dot_dimension_numbers<[2], [1], [1], [2], [0, 0, 0, 1, 1, 2], [0], [0]>} : vector<4x8x8xf32>, vector<4x8x32xf32>, vector<4x8x32xf32> -> vector<4x8x32xf32>
    "tpu.trace_stop"() : () -> ()
    %cst_21 = arith.constant dense<0.000000e+00> : vector<8x32xf32>
    %29 = vector.multi_reduction <add>, %28, %cst_21 [0] : vector<4x8x32xf32> to vector<8x32xf32>
    %c0_22 = arith.constant 0 : index
    %c0_23 = arith.constant 0 : index
    %30 = vector.load %arg9[%c0_22, %c0_23] : memref<1x32xf32, #tpu.memory_space<vmem>>, vector<1x32xf32>
    %31 = vector.shape_cast %30 : vector<1x32xf32> to vector<32xf32>
    %32 = vector.shape_cast %31 : vector<32xf32> to vector<1x32xf32>
    %33 = vector.broadcast %32 : vector<1x32xf32> to vector<8x32xf32>
    %34 = arith.addf %29, %33 : vector<8x32xf32>
    %35 = arith.addf %7, %34 : vector<8x32xf32>
    %c0_24 = arith.constant 0 : index
    %c0_25 = arith.constant 0 : index
    %36 = vector.load %arg10[%c0_24, %c0_25] : memref<1x32xf32, #tpu.memory_space<vmem>>, vector<1x32xf32>
    %37 = vector.shape_cast %36 : vector<1x32xf32> to vector<32xf32>
    %c0_26 = arith.constant 0 : index
    %c0_27 = arith.constant 0 : index
    %38 = vector.load %arg11[%c0_26, %c0_27] : memref<1x32xf32, #tpu.memory_space<vmem>>, vector<1x32xf32>
    %39 = vector.shape_cast %38 : vector<1x32xf32> to vector<32xf32>
    %cst_28 = arith.constant dense<0.000000e+00> : vector<8xf32>
    %40 = vector.multi_reduction <add>, %35, %cst_28 [1] : vector<8x32xf32> to vector<8xf32>
    %41 = vector.shape_cast %40 : vector<8xf32> to vector<8x1xf32>
    %cst_29 = arith.constant 3.200000e+01 : f32
    %42 = vector.broadcast %cst_29 : f32 to vector<8x1xf32>
    %43 = arith.divf %41, %42 : vector<8x1xf32>
    %44 = vector.broadcast %43 : vector<8x1xf32> to vector<8x32xf32>
    %45 = arith.subf %35, %44 : vector<8x32xf32>
    %46 = arith.mulf %45, %45 : vector<8x32xf32>
    %cst_30 = arith.constant dense<0.000000e+00> : vector<8xf32>
    %47 = vector.multi_reduction <add>, %46, %cst_30 [1] : vector<8x32xf32> to vector<8xf32>
    %48 = vector.shape_cast %47 : vector<8xf32> to vector<8x1xf32>
    %cst_31 = arith.constant 3.200000e+01 : f32
    %49 = vector.broadcast %cst_31 : f32 to vector<8x1xf32>
    %50 = arith.divf %48, %49 : vector<8x1xf32>
    %51 = vector.broadcast %43 : vector<8x1xf32> to vector<8x32xf32>
    %52 = arith.subf %35, %51 : vector<8x32xf32>
    %cst_32 = arith.constant 9.99999974E-6 : f32
    %53 = vector.broadcast %cst_32 : f32 to vector<8x1xf32>
    %54 = arith.addf %50, %53 : vector<8x1xf32>
    %55 = math.rsqrt %54 : vector<8x1xf32>
    %56 = vector.broadcast %55 : vector<8x1xf32> to vector<8x32xf32>
    %57 = arith.mulf %52, %56 : vector<8x32xf32>
    %58 = vector.shape_cast %37 : vector<32xf32> to vector<1x32xf32>
    %59 = vector.broadcast %58 : vector<1x32xf32> to vector<8x32xf32>
    %60 = arith.mulf %57, %59 : vector<8x32xf32>
    %61 = vector.shape_cast %39 : vector<32xf32> to vector<1x32xf32>
    %62 = vector.broadcast %61 : vector<1x32xf32> to vector<8x32xf32>
    %63 = arith.addf %60, %62 : vector<8x32xf32>
    %c0_33 = arith.constant 0 : index
    %c0_34 = arith.constant 0 : index
    %64 = vector.load %arg12[%c0_33, %c0_34] : memref<32x64xf32, #tpu.memory_space<vmem>>, vector<32x64xf32>
    %cst_35 = arith.constant dense<0.000000e+00> : vector<8x64xf32>
    %65 = tpu.matmul %63, %64, %cst_35 {dimension_numbers = #tpu.dot_dimension_numbers<[1], [0], [0], [1], [0, 0, 1, 1], [], []>} : vector<8x32xf32>, vector<32x64xf32>, vector<8x64xf32> -> vector<8x64xf32>
    %c0_36 = arith.constant 0 : index
    %c0_37 = arith.constant 0 : index
    %66 = vector.load %arg13[%c0_36, %c0_37] : memref<1x64xf32, #tpu.memory_space<vmem>>, vector<1x64xf32>
    %67 = vector.shape_cast %66 : vector<1x64xf32> to vector<64xf32>
    %68 = vector.shape_cast %67 : vector<64xf32> to vector<1x64xf32>
    %69 = vector.broadcast %68 : vector<1x64xf32> to vector<8x64xf32>
    %70 = arith.addf %65, %69 : vector<8x64xf32>
    %cst_38 = arith.constant 5.000000e-01 : f32
    %71 = vector.broadcast %cst_38 : f32 to vector<8x64xf32>
    %72 = arith.mulf %71, %70 : vector<8x64xf32>
    %cst_39 = arith.constant 0.707106769 : f32
    %73 = vector.broadcast %cst_39 : f32 to vector<8x64xf32>
    %74 = arith.mulf %70, %73 : vector<8x64xf32>
    %75 = math.absf %74 : vector<8x64xf32>
    %cst_40 = arith.constant 0.327591091 : f32
    %76 = vector.broadcast %cst_40 : f32 to vector<8x64xf32>
    %77 = arith.mulf %76, %75 : vector<8x64xf32>
    %cst_41 = arith.constant 1.000000e+00 : f32
    %78 = vector.broadcast %cst_41 : f32 to vector<8x64xf32>
    %79 = arith.addf %78, %77 : vector<8x64xf32>
    %cst_42 = arith.constant 1.000000e+00 : f32
    %80 = vector.broadcast %cst_42 : f32 to vector<8x64xf32>
    %81 = arith.divf %80, %79 : vector<8x64xf32>
    %cst_43 = arith.constant 1.06140542 : f32
    %82 = vector.broadcast %cst_43 : f32 to vector<8x64xf32>
    %83 = arith.mulf %82, %81 : vector<8x64xf32>
    %cst_44 = arith.constant -1.45315206 : f32
    %84 = vector.broadcast %cst_44 : f32 to vector<8x64xf32>
    %85 = arith.addf %83, %84 : vector<8x64xf32>
    %86 = arith.mulf %85, %81 : vector<8x64xf32>
    %cst_45 = arith.constant 1.42141378 : f32
    %87 = vector.broadcast %cst_45 : f32 to vector<8x64xf32>
    %88 = arith.addf %86, %87 : vector<8x64xf32>
    %89 = arith.mulf %88, %81 : vector<8x64xf32>
    %cst_46 = arith.constant -0.284496725 : f32
    %90 = vector.broadcast %cst_46 : f32 to vector<8x64xf32>
    %91 = arith.addf %89, %90 : vector<8x64xf32>
    %92 = arith.mulf %91, %81 : vector<8x64xf32>
    %cst_47 = arith.constant 0.254829586 : f32
    %93 = vector.broadcast %cst_47 : f32 to vector<8x64xf32>
    %94 = arith.addf %92, %93 : vector<8x64xf32>
    %95 = arith.mulf %94, %81 : vector<8x64xf32>
    %cst_48 = arith.constant 0.000000e+00 : f32
    %96 = vector.broadcast %cst_48 : f32 to vector<8x64xf32>
    %97 = arith.subf %96, %75 : vector<8x64xf32>
    %98 = arith.mulf %97, %75 : vector<8x64xf32>
    %99 = math.exp %98 : vector<8x64xf32>
    %100 = arith.mulf %95, %99 : vector<8x64xf32>
    %cst_49 = arith.constant 1.000000e+00 : f32
    %101 = vector.broadcast %cst_49 : f32 to vector<8x64xf32>
    %102 = arith.subf %101, %100 : vector<8x64xf32>
    %cst_50 = arith.constant 0.000000e+00 : f32
    %103 = vector.broadcast %cst_50 : f32 to vector<8x64xf32>
    %104 = arith.cmpf oge, %74, %103 : vector<8x64xf32>
    %cst_51 = arith.constant 0.000000e+00 : f32
    %105 = vector.broadcast %cst_51 : f32 to vector<8x64xf32>
    %106 = arith.subf %105, %102 : vector<8x64xf32>
    %107 = arith.select %104, %102, %106 : vector<8x64xi1>, vector<8x64xf32>
    %cst_52 = arith.constant 1.000000e+00 : f32
    %108 = vector.broadcast %cst_52 : f32 to vector<8x64xf32>
    %109 = arith.addf %108, %107 : vector<8x64xf32>
    %110 = arith.mulf %72, %109 : vector<8x64xf32>
    %c0_53 = arith.constant 0 : index
    %c0_54 = arith.constant 0 : index
    %111 = vector.load %arg14[%c0_53, %c0_54] : memref<64x32xf32, #tpu.memory_space<vmem>>, vector<64x32xf32>
    %cst_55 = arith.constant dense<0.000000e+00> : vector<8x32xf32>
    %112 = tpu.matmul %110, %111, %cst_55 {dimension_numbers = #tpu.dot_dimension_numbers<[1], [0], [0], [1], [0, 0, 1, 1], [], []>} : vector<8x64xf32>, vector<64x32xf32>, vector<8x32xf32> -> vector<8x32xf32>
    %c0_56 = arith.constant 0 : index
    %c0_57 = arith.constant 0 : index
    %113 = vector.load %arg15[%c0_56, %c0_57] : memref<1x32xf32, #tpu.memory_space<vmem>>, vector<1x32xf32>
    %114 = vector.shape_cast %113 : vector<1x32xf32> to vector<32xf32>
    %115 = vector.shape_cast %114 : vector<32xf32> to vector<1x32xf32>
    %116 = vector.broadcast %115 : vector<1x32xf32> to vector<8x32xf32>
    %117 = arith.addf %112, %116 : vector<8x32xf32>
    %118 = arith.addf %35, %117 : vector<8x32xf32>
    %c0_58 = arith.constant 0 : index
    %c0_59 = arith.constant 0 : index
    %c0_60 = arith.constant 0 : index
    %119 = vector.load %arg16[%c0_58, %c0_59, %c0_60] : memref<1x8x32xf32, #tpu.memory_space<vmem>>, vector<1x8x32xf32>
    %120 = vector.shape_cast %119 : vector<1x8x32xf32> to vector<8x32xf32>
    %121 = vector.shape_cast %118 : vector<8x32xf32> to vector<1x8x32xf32>
    tpu.vector_store %arg16[%c0_58, %c0_59, %c0_60], %121 {strides = array<i32>} : memref<1x8x32xf32, #tpu.memory_space<vmem>>, vector<1x8x32xf32>,
    return
  }
  func.func @transform_0(%arg0: i32, %arg1: i32) -> (i32, i32, i32) {
    %c0_i32 = arith.constant 0 : i32
    %c0_i32_0 = arith.constant 0 : i32
    %c0_i32_1 = arith.constant 0 : i32
    return %arg0, %c0_i32, %c0_i32_0 : i32, i32, i32
  }
  func.func @transform_1(%arg0: i32, %arg1: i32) -> (i32, i32, i32, i32) {
    %c0_i32 = arith.constant 0 : i32
    %c0_i32_0 = arith.constant 0 : i32
    %c0_i32_1 = arith.constant 0 : i32
    return %arg0, %c0_i32, %arg1, %c0_i32_0 : i32, i32, i32, i32
  }
  func.func @transform_2(%arg0: i32, %arg1: i32) -> (i32, i32) {
    %c0_i32 = arith.constant 0 : i32
    %c0_i32_0 = arith.constant 0 : i32
    %c0_i32_1 = arith.constant 0 : i32
    return %c0_i32, %c0_i32_0 : i32, i32
  }
  func.func @transform_3(%arg0: i32, %arg1: i32) -> (i32, i32) {
    %c0_i32 = arith.constant 0 : i32
    %c0_i32_0 = arith.constant 0 : i32
    %c0_i32_1 = arith.constant 0 : i32
    return %c0_i32, %c0_i32_0 : i32, i32
  }
  func.func @transform_4(%arg0: i32, %arg1: i32) -> (i32, i32) {
    %c0_i32 = arith.constant 0 : i32
    %c0_i32_0 = arith.constant 0 : i32
    %c0_i32_1 = arith.constant 0 : i32
    return %c0_i32, %c0_i32_0 : i32, i32
  }
  func.func @transform_5(%arg0: i32, %arg1: i32) -> (i32, i32) {
    %c0_i32 = arith.constant 0 : i32
    %c0_i32_0 = arith.constant 0 : i32
    %c0_i32_1 = arith.constant 0 : i32
    return %c0_i32, %c0_i32_0 : i32, i32
  }
  func.func @transform_6(%arg0: i32, %arg1: i32) -> (i32, i32, i32) {
    %c0_i32 = arith.constant 0 : i32
    %c0_i32_0 = arith.constant 0 : i32
    %c0_i32_1 = arith.constant 0 : i32
    %c0_i32_2 = arith.constant 0 : i32
    return %c0_i32, %c0_i32_0, %c0_i32_1 : i32, i32, i32
  }
  func.func @transform_7(%arg0: i32, %arg1: i32) -> (i32, i32) {
    %c0_i32 = arith.constant 0 : i32
    %c0_i32_0 = arith.constant 0 : i32
    %c0_i32_1 = arith.constant 0 : i32
    return %c0_i32, %c0_i32_0 : i32, i32
  }
  func.func @transform_8(%arg0: i32, %arg1: i32) -> (i32, i32) {
    %c0_i32 = arith.constant 0 : i32
    %c0_i32_0 = arith.constant 0 : i32
    %c0_i32_1 = arith.constant 0 : i32
    return %c0_i32, %c0_i32_0 : i32, i32
  }
  func.func @transform_9(%arg0: i32, %arg1: i32) -> (i32, i32) {
    %c0_i32 = arith.constant 0 : i32
    %c0_i32_0 = arith.constant 0 : i32
    %c0_i32_1 = arith.constant 0 : i32
    return %c0_i32, %c0_i32_0 : i32, i32
  }
  func.func @transform_10(%arg0: i32, %arg1: i32) -> (i32, i32) {
    %c0_i32 = arith.constant 0 : i32
    %c0_i32_0 = arith.constant 0 : i32
    %c0_i32_1 = arith.constant 0 : i32
    return %c0_i32, %c0_i32_0 : i32, i32
  }
  func.func @transform_11(%arg0: i32, %arg1: i32) -> (i32, i32) {
    %c0_i32 = arith.constant 0 : i32
    %c0_i32_0 = arith.constant 0 : i32
    %c0_i32_1 = arith.constant 0 : i32
    return %c0_i32, %c0_i32_0 : i32, i32
  }
  func.func @transform_12(%arg0: i32, %arg1: i32) -> (i32, i32) {
    %c0_i32 = arith.constant 0 : i32
    %c0_i32_0 = arith.constant 0 : i32
    %c0_i32_1 = arith.constant 0 : i32
    return %c0_i32, %c0_i32_0 : i32, i32
  }
  func.func @transform_13(%arg0: i32, %arg1: i32) -> (i32, i32) {
    %c0_i32 = arith.constant 0 : i32
    %c0_i32_0 = arith.constant 0 : i32
    %c0_i32_1 = arith.constant 0 : i32
    return %c0_i32, %c0_i32_0 : i32, i32
  }
  func.func @transform_14(%arg0: i32, %arg1: i32) -> (i32, i32, i32) {
    %c0_i32 = arith.constant 0 : i32
    %c0_i32_0 = arith.constant 0 : i32
    return %arg0, %arg1, %c0_i32 : i32, i32, i32
  }
}

</mosaic_0001>

<bundles_post_ra>
// kernel: tpu_custom_call.1
= control target key start
LH: loop header
LB: loop body
LE: loop exit
PB: predicated region body
PF: predicated region fallthrough
CT: control target
= control target key end

     0   :  { %s3163_s0 = inlined_call_operand.vmem [shape: f32[2,16,32], index: 0, kind: input, shape index: {}]   ;;  %s3164_s1 = inlined_call_operand.hbm [shape: f32[2,4,16,16], index: 1, kind: input, shape index: {}]   ;;  %s3165_s2 = inlined_call_operand.vmem [shape: f32[1,32], index: 2, kind: input, shape index: {}]   ;;  %s3166_s3 = inlined_call_operand.vmem [shape: f32[1,32], index: 3, kind: input, shape index: {}]   ;;  %s3167_s4 = inlined_call_operand.vmem [shape: f32[32,96], index: 4, kind: input, shape index: {}]   ;;  %s3168_s5 = inlined_call_operand.vmem [shape: f32[1,96], index: 5, kind: input, shape index: {}]   ;;  %s3169_s6 = inlined_call_operand.vmem [shape: f32[4,8,32], index: 6, kind: input, shape index: {}]   ;;  %s3170_s7 = inlined_call_operand.vmem [shape: f32[1,32], index: 7, kind: input, shape index: {}]   ;;  %s3171_s8 = inlined_call_operand.vmem [shape: f32[1,32], index: 8, kind: input, shape index: {}]   ;;  %s3172_s9 = inlined_call_operand.vmem [shape: f32[1,32], index: 9, kind: input, shape index: {}]   ;;  %s3173_s10 = inlined_call_operand.hbm [shape: f32[32,64], index: 10, kind: input, shape index: {}]   ;;  %s3174_s11 = inlined_call_operand.vmem [shape: f32[1,64], index: 11, kind: input, shape index: {}]   ;;  %s3175_s12 = inlined_call_operand.vmem [shape: f32[64,32], index: 12, kind: input, shape index: {}]   ;;  %s3176_s13 = inlined_call_operand.vmem [shape: f32[1,32], index: 13, kind: input, shape index: {}]   ;;  %s3177_s14 = inlined_call_operand.hbm [shape: f32[2,16,32], index: 14, kind: output, shape index: {}]  }
   0x1   :  { %3194 = sst [smem:[#allocation20_spill]] %s3168_s5 }
   0x2   :  { %3195 = sst [smem:[#allocation21_spill]] %s3169_s6 }
   0x3   :  { %3196 = sst [smem:[#allocation22_spill]] %s3170_s7 }
   0x4   :  { %3197 = sst [smem:[#allocation23_spill]] %s3171_s8 }
   0x5   :  { %3198 = sst [smem:[#allocation24_spill]] %s3172_s9 }
   0x6   :  { %3199 = sst [smem:[#allocation25_spill]] %s3173_s10 }
   0x7   :  { %3200 = sst [smem:[#allocation26_spill]] %s3174_s11 }
   0x8   :  { %3201 = sst [smem:[#allocation27_spill]] %s3175_s12 }
   0x9   :  { %3202 = sst [smem:[#allocation28_spill]] %s3176_s13 }
   0xa   :  { %3203 = sst [smem:[#allocation29_spill]] %s3177_s14 }
   0xb   :  { %19 = vsyncpa [#allocation6], 0 }
   0xc   :  { %21 = vsyncpa [#allocation6 + $0x1], 0 }
   0xd   :  { %22 = vsyncpa [#allocation9], 0 }
   0xe   :  { %23 = vsyncpa [#allocation7], 0 }
   0xf   :  { %25 = vsyncpa [#allocation7 + $0x1], 0  ;;  %s2742_s29 = smov 0   ;;  %s2744_s30 = smov 0  }
  0x10   :  { %s2746_s15 = smov 0   ;;  %s2748_s16 = smov 0  }
  0x11   :  { %s2750_s17 = smov 0   ;;  %s2752_s18 = smov 0  }
  0x12   :  { %s2754_s19 = smov 0   ;;  %s2756_s20 = smov 0  }
  0x13 LB: > { %3204 = sst [smem:[#allocation14_spill]] %s2618_s29  ;;  %s2138_s21 = sadd.s32 4294967295, %s2646_s20   ;;  %s2646_s20 = sphi %s2756_s20, %s31_s20   ;;  %s2642_s19 = sphi %s2754_s19, %s3245_s19   ;;  %s2638_s18 = sphi %s2752_s18, %s3240_s18   ;;  %s2634_s17 = sphi %s2750_s17, %s3244_s17   ;;  %s2630_s16 = sphi %s2748_s16, %s3239_s16   ;;  %s2626_s15 = sphi %s2746_s15, %s3243_s15   ;;  %s2622_s30 = sphi %s2744_s30, %s3242_s30   ;;  %s2618_s29 = sphi %s2742_s29, %s3241_s29  }
  0x14   : > { %3205 = sst [smem:[#allocation15_spill]] %s2638_s18  ;;  %s2139_s22 = sadd.s32 4294967294, %s2646_s20  }
  0x15   : > { %3206 = sst [smem:[#allocation16_spill]] %s2646_s20  ;;  %p85_p0 = scmp.ne.s32.totalorder %s2626_s15, %s2622_s30 }
  0x16   : > { %p86_p1 = scmp.eq.s32.totalorder %s2646_s20, 0  ;;  %p91_p2 = scmp.ne.s32.totalorder %s2622_s30, %s2618_s29 }
  0x17   : > { %p2790_p3 = scmp.eq.s32.totalorder %s2138_s21, 0  ;;  %p369_p4 = scmp.eq.s32.totalorder %s2138_s21, 3 }
  0x18   : > { %p2794_p5 = por %p86_p1, %p85_p0  ;;  %p375_p6 = scmp.eq.s32.totalorder %s2139_s22, 3 }
  0x19   : > { %p2800_p7 = por %p2790_p3, %p91_p2  ;;  %p2804_p8 = por %p369_p4, %p85_p0 }
  0x1a   : > { %p2808_p9 = por %p375_p6, %p91_p2  ;;  %p2140_p10 = scmp.ge.s32.totalorder %s2646_s20, 1 }
  0x1b   : > { %s3209_s26 = scalar_select %p2800_p7, 1, 0 }
  0x1c   : > { %s3210_s27 = scalar_select %p2804_p8, 1, 0 }
  0x1d   : > { %s3212_s28 = scalar_select %p2808_p9, 1, 0 }
  0x1e   : > { %3211 = sst [smem:[#allocation17_spill]] %s3210_s27  ;;  %p382_p11 = scmp.lt.s32.totalorder %s2646_s20, 5 }
  0x1f   : > { %3213 = sst [smem:[#allocation18_spill]] %s3212_s28  ;;  %s2648_s22 = smov [#allocation8]  }
  0x20   : > { %p2814_p12 = pnand %p2140_p10, %p382_p11  ;;  %s418_s23 = sshll.u32 %s2648_s22, 4  ;;  %s419_s23 = int_to_ptr.vmem [resolvable:$true] %s418_s23 }
  0x21   : > { %p2382_p0 = scmp.lt.s32.totalorder %s2646_s20, 4  ;;  %s2503_s14 = scalar_lea.vmem %s419_s23, 512 }
  0x22   : > { %s3214_s21 = scalar_select %p2814_p12, 1, 0 }
  0x23   : > { %p2369_p13 = pneg %p2814_p12  ;;  %p2829_p2 = pnand %p2382_p0, %p2794_p5 }
  0x24   : > { %p2504_p6 = scmp.ne.s32.totalorder %s419_s23, %s2503_s14  ;;  %p2511_p9 = scmp.lt.s32.totalorder %s419_s23, %s419_s23 }
  0x25   : > { %p2823_p1 = pnand %p2369_p13, %p2790_p3  ;;  %p2512_p8 = scmp.lt.s32.totalorder %s2503_s14, %s2503_s14 }
  0x27   : > { %p2494_p4 = pneg %p2823_p1  ;;  %p2513_p7 = por %p2512_p8, %p2511_p9 }
  0x29   : > { %p2506_p10 = pnand %p2504_p6, %p2494_p4 }
  0x2b   : > { %p2507_p11 = pneg %p2506_p10 }
  0x2d   : > { %p2514_p12 = pnand %p2513_p7, %p2507_p11 }
  0x2f   : > { %2517 = shalt.err (!%p2514_p12)
}
  0x30   : > { %s3189_s22 = smov 128   ;;  %s3190_s25 = smov 8  }
  0x31   : > { %s3217_s10 = sld [smem:[#allocation25_spill]]  ;;  %s40_s14 = sadd.s32 1, %s2638_s18 }
  0x32   : > { %p41_p5 = scmp.ge.s32.totalorder %s40_s14, 2  ;;  %s43_s27 = sadd.s32 1, %s2642_s19 }
  0x33   : > { %s449_s11 = sand.u32 1, %s2626_s15   ;;  %s2144_s12 = sshll.u32 %s2642_s19, 3 }
  0x34   : > { %s3247_s14 = smov (%p41_p5, %s40_s14), 0  ;;  %s3249_s27 = smov (!%p41_p5, %s43_s27), %s2642_s19 }
  0x35   : > { %3218 = sst [smem:[#allocation19_spill]] %s3247_s14  ;;  %s74_s9 = ssub.s32 %s2638_s18, %s3247_s14 }
  0x36   : > { %p45_p7 = scmp.ge.s32.totalorder %s3249_s27, 2  ;;  %s2143_s29 = sshll.u32 %s449_s11, 5 }
  0x37   : > { %2372 = dma.hbm_to_vmem [thread:$0]  (!%p2823_p1), %s3217_s10, 512, %s419_s23, [#allocation9], %s3189_s22, %s3189_s22, %s3190_s25  }
  0x38   : > { %s458_s8 = sadd.s32 %s2638_s18, %s2144_s12  ;;  %s3251_s27 = smov (%p45_p7, %s3249_s27), 0 }
  0x39   : > { %s2145_s13 = sshll.u32 %s458_s8, 7  ;;  %s453_s20 = scalar_lea.vmem [#allocation5], %s2143_s29 }
  0x3a   : > { %s461_s23 = sshll.u32 %s453_s20, 4  ;;  %s73_s22 = ssub.s32 %s2642_s19, %s3251_s27  ;;  %s462_s23 = int_to_ptr.vmem [resolvable:$true] %s461_s23 }
  0x3b   : > { %s460_s7 = scalar_lea.hbm %s3164_s1, %s2145_s13  ;;  %s75_s6 = sor.u32 %s74_s9, %s73_s22 }
  0x3c   : > { %p76_p8 = scmp.eq.s32.totalorder %s75_s6, 0  ;;  %s450_s5 = scalar_lea.sflag [#allocation6], %s449_s11 }
  0x3d   : > { %p2520_p9 = pneg %p2829_p2  ;;  %s2531_s14 = scalar_lea.vmem %s462_s23, 512 }
  0x3e   : > { %p2532_p12 = scmp.ne.s32.totalorder %s462_s23, %s2531_s14  ;;  %s2651_s12 = smov [#allocation5]  }
  0x3f   : > { %s2536_s18 = sshll.u32 %s2651_s12, 4  ;;  %s2537_s18 = int_to_ptr.vmem [resolvable:$false] %s2536_s18 }
  0x40   : > { %p2534_p13 = pnand %p2532_p12, %p2520_p9  ;;  %s2538_s8 = scalar_lea.vmem %s2537_s18, 1024 }
  0x41   : > { %p2539_p1 = scmp.lt.s32.totalorder %s462_s23, %s2537_s18  ;;  %p2540_p4 = scmp.lt.s32.totalorder %s2538_s8, %s2531_s14 }
  0x42   : > { %p2535_p0 = pneg %p2534_p13 }
  0x43   : > { %p2541_p6 = por %p2540_p4, %p2539_p1 }
  0x45   : > { %p2542_p10 = pnand %p2541_p6, %p2535_p0 }
  0x47   : > { %2545 = shalt.err (!%p2542_p10)
}
  0x48   : > { %s2652_s10 = smov 256   ;;  %s3219_s9 = smov 8  }
  0x49   : > { %s3220_s11 = smov 128   ;;  %s3221_s22 = sadd.s32 1, %s2626_s15 }
  0x4a   : > { %2376 = dma.hbm_to_vmem [thread:$0]  (!%p2829_p2), %s460_s7, 512, %s462_s23, %s450_s5, %s2652_s10, %s3220_s11, %s3219_s9  }
  0x4b   : > { %s2870_s25 = scalar_select %p76_p8, %s2626_s15, %s3221_s22  }
  0x4c   : > { %p3222_p11 = scmp.ne.s32.totalorder %s3214_s21, 0 }
  0x4d   : > { %s2875_s18 = sand.u32 (!%p3222_p11), 1, %s2622_s30   ;;  %p3223_p5 = scmp.ne.s32.totalorder (!%p3222_p11), %s3209_s26, 0 }
  0x4e   : > { %473 = sbr.rel (%p3222_p11) target bundleno = 2447 (0x98f), region = 76  ;;  %s2147_s14 = sshll.u32 (!%p3222_p11), %s2875_s18, 5 }
  0x4f   : > { %s476_s28 = scalar_lea.sflag (!%p3222_p11), [#allocation6], %s2875_s18  ;;  %s2879_s29 = scalar_lea.vmem (!%p3222_p11), [#allocation5], %s2147_s14 }
  0x53   : > { %2605 = dma.done.wait (%p3223_p5), %s476_s28, 512  }
  0x54   : > { %2607 = vsyncadd (%p3223_p5), %s476_s28, 4294966784 }
  0x55   : > { %2609 = dma.done.wait (%p2790_p3), [#allocation9], 512  }
  0x56   : > { %2611 = vsyncadd (%p2790_p3), [#allocation9], 4294966784  ;;  %s2149_s5 = sshll.u32 %s2875_s18, 3  ;;  %p533_p2 = scmp.lt.s32.totalorder %s2634_s17, 1 }
  0x57   : > { %s2897_s26 = scalar_lea.vmem [#allocation10], %s2149_s5  ;;  %p2152_p7 = scmp.ne.s32.totalorder %s2630_s16, 0 }
  0x58   : > { %s534_s6 = scalar_select %p533_p2, %s2634_s17, 1 }
  0x59   : > { %541 = sbr.rel (%p2152_p7) target bundleno = 762 (0x2fa), region = 88  ;;  %s3224_s13 = sld [smem:[#allocation20_spill]] (!%p2152_p7) }
  0x5a   : > { %s2191_s7 = sshll.u32 %s534_s6, 4  ;;  %s2653_s24 = smov (!%p2152_p7), 96  }
  0x5b   : > { %s2895_s20 = scalar_lea.vmem %s3163_s0, %s2191_s7  ;;  %s2654_s23 = smov (!%p2152_p7), 64  }
  0x5c   : > { %s2655_s12 = smov (!%p2152_p7), 120   ;;  %s2656_s8 = smov (!%p2152_p7), 88  }
  0x5d   : > { %s2657_s10 = smov (!%p2152_p7), 56   ;;  %s2658_s9 = smov (!%p2152_p7), 112  }
  0x5e   : > { %v542_v0 = vld [vmem:[%s2895_s20] sm:$0xff]  ;;  %vm546_vm0 = vcmask 261120   ;;  %v543_v1 = vld [vmem:[%s2895_s20 + $0x8] sm:$0xff]  ;;  %v593_v14 = vld [vmem:[%s3167_s4 + $0x18] sm:$0xff]  ;;  %vm682_vm1 = vcmask 64512   ;;  %s2659_s11 = smov 80  }
  0x5f   : > { %v547_v2 = vsel %vm546_vm0, %v542_v0, 0.0  ;;  %v550_v3 = vsel %vm546_vm0, %v543_v1, 0.0  ;;  %v592_v15 = vld [vmem:[%s3167_s4 + $0x10] sm:$0xff]  ;;  %2244 = vmatprep.subr.mxu0 %v593_v14  ;;  %v591_v16 = vld [vmem:[%s3167_s4 + $0x8] sm:$0xff]  ;;  %v590_v17 = vld [vmem:[%s3167_s4] sm:$0xff]  ;;  %s2660_s22 = smov 48  }
  0x60   : > { %548 = vadd.xlane.f32.xlu0 %v547_v2  ;;  %2245 = vmatpush3.msra.mxu0 %v593_v14  ;;  %v2153_v25 = vld [vmem:[%s3165_s2] ss:$0 sm:$0xff]  ;;  %s2661_s14 = smov 104   ;;  %s2662_s28 = smov 72  }
  0x61   : > { %2246 = vmatprep.subr.mxu0 %v592_v15  ;;  %v2154_v27 = vld [vmem:[%s3166_s3] ss:$0 sm:$0xff]  ;;  %s2663_s5 = smov 40  }
  0x62   : > { %2247 = vmatpush3.msra.mxu0 %v592_v15  ;;  %v2155_v34 = vld [vmem:[%s3224_s13] ss:$0 sm:$0xff] }
  0x63   : > { %2248 = vmatprep.subr.mxu0 %v591_v16 }
  0x64   : > { %551 = vadd.xlane.f32.xlu0 %v550_v3  ;;  %2249 = vmatpush3.msra.mxu0 %v591_v16 }
  0x65   : > { %2250 = vmatprep.subr.mxu0 %v590_v17 }
  0x66   : > { %2251 = vmatpush3.msra.mxu0 %v590_v17 }
  0xe9   : > { %v549_v4 = vpop.xlane.xlu0 %548 }
  0xea   : > { %v554_v5 = vmul.f32 0.03125, %v549_v4 }
  0xec   : > { %v556_v6 = vsub.f32 %v542_v0, %v554_v5 }
  0xed   : > { %v552_v7 = vpop.xlane.xlu0 %551 }
  0xee   : > { %v555_v8 = vmul.f32 0.03125, %v552_v7  ;;  %v558_v9 = vmul.f32 %v556_v6, %v556_v6 }
  0xf0   : > { %v557_v10 = vsub.f32 %v543_v1, %v555_v8  ;;  %v560_v11 = vsel %vm546_vm0, %v558_v9, 0.0 }
  0xf1   : > { %561 = vadd.xlane.f32.xlu1 %v560_v11 }
  0xf2   : > { %v559_v12 = vmul.f32 %v557_v10, %v557_v10 }
  0xf4   : > { %v563_v13 = vsel %vm546_vm0, %v559_v12, 0.0 }
  0xf5   : > { %564 = vadd.xlane.f32.xlu1 %v563_v13 }
 0x17a   : > { %v562_v18 = vpop.xlane.xlu1 %561 }
 0x17b   : > { %v566_v19 = vmul.f32 0.03125, %v562_v18 }
 0x17d   : > { %v568_v20 = vadd.f32 1e-05, %v566_v19 }
 0x17e   : > { %v565_v21 = vpop.xlane.xlu1 %564 }
 0x17f   : > { %2466 = vrsqrt.f32 %v568_v20  ;;  %v567_v22 = vmul.f32 0.03125, %v565_v21 }
 0x181   : > { %v569_v23 = vadd.f32 1e-05, %v567_v22 }
 0x183   : > { %2468 = vrsqrt.f32 %v569_v23 }
 0x18c   : > { %v2467_v24 = vpop.eup %2466 }
 0x18d   : > { %v572_v26 = vmul.f32 %v2467_v24, %v556_v6 }
 0x18f   : > { %v580_v28 = vmul.f32 %v2153_v25, %v572_v26 }
 0x190   : > { %v2469_v29 = vpop.eup %2468 }
 0x191   : > { %v573_v30 = vmul.f32 %v2469_v29, %v557_v10  ;;  %v588_v31 = vadd.f32 %v2154_v27, %v580_v28 }
 0x193   : > { %v581_v32 = vmul.f32 %v2153_v25, %v573_v30  ;;  %2252 = vmatprep.mubr.msk.f32.mxu0 %vm546_vm0, %v588_v31 }
 0x195   : > { %v589_v33 = vadd.f32 %v2154_v27, %v581_v32 }
 0x197   : > { %2253 = vmatmul.mubr.msk.f32.vlgmr.msra.gmra.mxu0 %vm546_vm0, %v589_v33 }
 0x257   : > { %v2254_v35 = vpop.f32.mrf.mxu0 }
 0x258   : > { %v679_v36 = vadd.f32 %v2254_v35, %v2155_v34 }
 0x259   : > { %v673_v37 = vpop.f32.mrf.mxu0 }
 0x25a   : > { %684 = vst.msk [vmem:[#allocation2 + $0x8] sm:$0xff] %vm682_vm1, %v679_v36  ;;  %v674_v38 = vadd.f32 %v2155_v34, %v673_v37  ;;  %689 = vrot.lane.b32.xlu1 %v679_v36, %s2653_s24 }
 0x25c   : > { %683 = vst.msk [vmem:[#allocation2] sm:$0xff] %vm682_vm1, %v674_v38  ;;  %687 = vrot.lane.b32.xlu0 %v674_v38, %s2653_s24 }
 0x25e   : > { %697 = vrot.lane.b32.xlu1 %v679_v36, %s2654_s23 }
 0x260   : > { %703 = vrot.lane.b32.xlu0 %v674_v38, %s2655_s12 }
 0x262   : > { %705 = vrot.lane.b32.xlu1 %v679_v36, %s2655_s12 }
 0x264   : > { %712 = vrot.lane.b32.xlu0 %v674_v38, %s2656_s8 }
 0x266   : > { %714 = vrot.lane.b32.xlu1 %v679_v36, %s2656_s8 }
 0x268   : > { %721 = vrot.lane.b32.xlu0 %v674_v38, %s2657_s10 }
 0x26a   : > { %723 = vrot.lane.b32.xlu1 %v679_v36, %s2657_s10 }
 0x26c   : > { %730 = vrot.lane.b32.xlu0 %v674_v38, %s2658_s9 }
 0x26e   : > { %732 = vrot.lane.b32.xlu1 %v679_v36, %s2658_s9 }
 0x270   : > { %739 = vrot.lane.b32.xlu0 %v674_v38, %s2659_s11 }
 0x272   : > { %741 = vrot.lane.b32.xlu1 %v679_v36, %s2659_s11 }
 0x274   : > { %748 = vrot.lane.b32.xlu0 %v674_v38, %s2660_s22 }
 0x276   : > { %750 = vrot.lane.b32.xlu1 %v679_v36, %s2660_s22 }
 0x278   : > { %757 = vrot.lane.b32.xlu0 %v674_v38, %s2661_s14 }
 0x27a   : > { %759 = vrot.lane.b32.xlu1 %v679_v36, %s2661_s14 }
 0x27c   : > { %766 = vrot.lane.b32.xlu0 %v674_v38, %s2662_s28 }
 0x27e   : > { %768 = vrot.lane.b32.xlu1 %v679_v36, %s2662_s28 }
 0x280   : > { %775 = vrot.lane.b32.xlu0 %v674_v38, %s2663_s5 }
 0x282   : > { %695 = vrot.lane.b32.xlu1 %v674_v38, %s2654_s23 }
 0x286   : > { %777 = vrot.lane.b32.xlu1 %v679_v36, %s2663_s5 }
 0x2cc   : > { %v690_v39 = vpop.permute.xlu1 %689 }
 0x2cd   : > { %694 = vst.msk [vmem:[#allocation3 + $0x8] sm:$0xff] %vm682_vm1, %v690_v39 }
 0x2ce   : > { %v688_v40 = vpop.permute.xlu0 %687 }
 0x2cf   : > { %693 = vst.msk [vmem:[#allocation3] sm:$0xff] %vm682_vm1, %v688_v40 }
 0x2d0   : > { %v698_v41 = vpop.permute.xlu1 %697 }
 0x2d1   : > { %702 = vst.msk [vmem:[#allocation4 + $0x8] sm:$0xff] %vm682_vm1, %v698_v41 }
 0x2d2   : > { %v704_v42 = vpop.permute.xlu0 %703 }
 0x2d3   : > { %710 = vst.msk [vmem:[#allocation2 + $0x10] sm:$0xff] %vm682_vm1, %v704_v42 }
 0x2d4   : > { %v706_v43 = vpop.permute.xlu1 %705 }
 0x2d5   : > { %711 = vst.msk [vmem:[#allocation2 + $0x18] sm:$0xff] %vm682_vm1, %v706_v43 }
 0x2d6   : > { %v713_v44 = vpop.permute.xlu0 %712 }
 0x2d7   : > { %719 = vst.msk [vmem:[#allocation3 + $0x10] sm:$0xff] %vm682_vm1, %v713_v44 }
 0x2d8   : > { %v715_v45 = vpop.permute.xlu1 %714 }
 0x2d9   : > { %720 = vst.msk [vmem:[#allocation3 + $0x18] sm:$0xff] %vm682_vm1, %v715_v45 }
 0x2da   : > { %v722_v46 = vpop.permute.xlu0 %721 }
 0x2db   : > { %728 = vst.msk [vmem:[#allocation4 + $0x10] sm:$0xff] %vm682_vm1, %v722_v46 }
 0x2dc   : > { %v724_v47 = vpop.permute.xlu1 %723 }
 0x2dd   : > { %729 = vst.msk [vmem:[#allocation4 + $0x18] sm:$0xff] %vm682_vm1, %v724_v47 }
 0x2de   : > { %v731_v48 = vpop.permute.xlu0 %730 }
 0x2df   : > { %737 = vst.msk [vmem:[#allocation2 + $0x20] sm:$0xff] %vm682_vm1, %v731_v48 }
 0x2e0   : > { %v733_v49 = vpop.permute.xlu1 %732 }
 0x2e1   : > { %738 = vst.msk [vmem:[#allocation2 + $0x28] sm:$0xff] %vm682_vm1, %v733_v49 }
 0x2e2   : > { %v740_v50 = vpop.permute.xlu0 %739 }
 0x2e3   : > { %746 = vst.msk [vmem:[#allocation3 + $0x20] sm:$0xff] %vm682_vm1, %v740_v50 }
 0x2e4   : > { %v742_v51 = vpop.permute.xlu1 %741 }
 0x2e5   : > { %747 = vst.msk [vmem:[#allocation3 + $0x28] sm:$0xff] %vm682_vm1, %v742_v51 }
 0x2e6   : > { %v749_v52 = vpop.permute.xlu0 %748 }
 0x2e7   : > { %755 = vst.msk [vmem:[#allocation4 + $0x20] sm:$0xff] %vm682_vm1, %v749_v52 }
 0x2e8   : > { %v751_v53 = vpop.permute.xlu1 %750 }
 0x2e9   : > { %756 = vst.msk [vmem:[#allocation4 + $0x28] sm:$0xff] %vm682_vm1, %v751_v53 }
 0x2ea   : > { %v758_v54 = vpop.permute.xlu0 %757 }
 0x2eb   : > { %764 = vst.msk [vmem:[#allocation2 + $0x30] sm:$0xff] %vm682_vm1, %v758_v54 }
 0x2ec   : > { %v760_v55 = vpop.permute.xlu1 %759 }
 0x2ed   : > { %765 = vst.msk [vmem:[#allocation2 + $0x38] sm:$0xff] %vm682_vm1, %v760_v55 }
 0x2ee   : > { %v767_v56 = vpop.permute.xlu0 %766 }
 0x2ef   : > { %773 = vst.msk [vmem:[#allocation3 + $0x30] sm:$0xff] %vm682_vm1, %v767_v56 }
 0x2f0   : > { %v769_v57 = vpop.permute.xlu1 %768 }
 0x2f1   : > { %774 = vst.msk [vmem:[#allocation3 + $0x38] sm:$0xff] %vm682_vm1, %v769_v57 }
 0x2f2   : > { %v776_v58 = vpop.permute.xlu0 %775 }
 0x2f3   : > { %782 = vst.msk [vmem:[#allocation4 + $0x30] sm:$0xff] %vm682_vm1, %v776_v58 }
 0x2f4   : > { %v696_v59 = vpop.permute.xlu1 %695 }
 0x2f5   : > { %701 = vst.msk [vmem:[#allocation4] sm:$0xff] %vm682_vm1, %v696_v59 }
 0x2f8   : > { %v778_v60 = vpop.permute.xlu1 %777 }
 0x2f9   : > { %783 = vst.msk [vmem:[#allocation4 + $0x38] sm:$0xff] %vm682_vm1, %v778_v60 }
 0x2fa PF: > { %v793_v61 = vld [vmem:[#allocation3 + $0x8] sm:$0xff]  ;;  %vm812_vm2 = vcmask 64512   ;;  %v795_v62 = vld [vmem:[#allocation3 + $0x18] sm:$0xff]  ;;  %v2664_v63 = vmov 0.0   ;;  %s2158_s6 = sshll.u32 %s2630_s16, 3  ;;  %v792_v0 = vld [vmem:[#allocation3] sm:$0xff] }
 0x2fb   : > { %2255 = vmatprep.subr.mxu0 %v2664_v63  ;;  %2262 = vmatprep.subr.mxu1 %v2664_v63  ;;  %v794_v1 = vld [vmem:[#allocation3 + $0x10] sm:$0xff]  ;;  %vm2665_vm3 = vmmov 0   ;;  %s787_s7 = scalar_lea.vmem [#allocation2], %s2158_s6  ;;  %v797_v4 = vld [vmem:[#allocation3 + $0x28] sm:$0xff]  ;;  %v799_v5 = vld [vmem:[#allocation3 + $0x38] sm:$0xff]  ;;  %vm1129_vm4 = vcmask 130048   ;;  %s785_s11 = scalar_lea.vmem %s2895_s20, %s2158_s6 }
 0x2fc   : > { %2256 = vmatpush3.xpose.msk.msra.mxu0 %vm812_vm2, %v793_v61  ;;  %2263 = vmatpush3.xpose.msk.msra.mxu1 %vm812_vm2, %v795_v62  ;;  %v788_v2 = vld [vmem:[%s787_s7] sm:$0xff]  ;;  %v789_v3 = vld [vmem:[%s787_s7 + $0x10] sm:$0xff]  ;;  %v809_v11 = vld [vmem:[%s2879_s29 + $0x8] sm:$0xff]  ;;  %s3225_s13 = sld [smem:[#allocation21_spill]]  ;;  %vm1762_vm5 = vcmask 261120   ;;  %vm1935_vm7 = vcmask 523264  }
 0x2fd   : > { %2257 = vmatprep.subr.mxu0 %v2664_v63  ;;  %2264 = vmatprep.subr.mxu1 %v2664_v63  ;;  %v796_v6 = vld [vmem:[#allocation3 + $0x20] sm:$0xff]  ;;  %v798_v7 = vld [vmem:[#allocation3 + $0x30] sm:$0xff]  ;;  %v811_v21 = vld [vmem:[%s2879_s29 + $0x18] sm:$0xff]  ;;  %s3226_s28 = sld [smem:[#allocation22_spill]]  ;;  %s2666_s23 = smov [#allocation10]  }
 0x2fe   : > { %2259 = vmatprep.mubr.msk.f32.mxu0 %vm2665_vm3, %v2664_v63  ;;  %2266 = vmatprep.mubr.msk.f32.mxu1 %vm2665_vm3, %v2664_v63  ;;  %v790_v8 = vld [vmem:[%s787_s7 + $0x20] sm:$0xff]  ;;  %v791_v9 = vld [vmem:[%s787_s7 + $0x30] sm:$0xff]  ;;  %v801_v50 = vld [vmem:[#allocation4 + $0x8] sm:$0xff]  ;;  %s3227_s6 = sld [smem:[#allocation23_spill]]  ;;  %s2550_s8 = sshll.u32 %s2666_s23, 4  ;;  %s2551_s8 = int_to_ptr.vmem [resolvable:$false] %s2550_s8 }
 0x2ff   : > { %v808_v10 = vld [vmem:[%s2879_s29] sm:$0xff]  ;;  %v810_v20 = vld [vmem:[%s2879_s29 + $0x10] sm:$0xff]  ;;  %v803_v60 = vld [vmem:[#allocation4 + $0x18] sm:$0xff]  ;;  %s3228_s21 = sld [smem:[#allocation24_spill]] }
 0x300   : > { %2258 = vmatpush3.xpose.msk.msra.mxu0 %vm812_vm2, %v792_v0  ;;  %2265 = vmatpush3.xpose.msk.msra.mxu1 %vm812_vm2, %v794_v1  ;;  %v800_v51 = vld [vmem:[#allocation4] sm:$0xff]  ;;  %v807_v52 = vld [vmem:[#allocation4 + $0x38] sm:$0xff]  ;;  %v806_v53 = vld [vmem:[#allocation4 + $0x30] sm:$0xff]  ;;  %s3229_s12 = sld [smem:[#allocation27_spill]] }
 0x301   : > { %2269 = vmatprep.subr.mxu0 %v2664_v63  ;;  %2276 = vmatprep.subr.mxu1 %v2664_v63  ;;  %v802_v61 = vld [vmem:[#allocation4 + $0x10] sm:$0xff]  ;;  %v805_v1 = vld [vmem:[#allocation4 + $0x28] sm:$0xff]  ;;  %s3230_s10 = sld [smem:[#allocation26_spill]] }
 0x302   : > { %s3231_s9 = sld [smem:[#allocation17_spill]] }
 0x303   : > { %2260 = vmatmul.mubr.msk.f32.vlgmr.msra.gmra.mxu0 %vm812_vm2, %v788_v2  ;;  %2267 = vmatmul.mubr.msk.f32.vlgmr.msra.gmra.mxu1 %vm812_vm2, %v789_v3  ;;  %v804_v2 = vld [vmem:[#allocation4 + $0x20] sm:$0xff]  ;;  %s3232_s20 = sld [smem:[#allocation28_spill]] }
 0x304   : > { %2270 = vmatpush3.xpose.msk.msra.mxu0 %vm812_vm2, %v797_v4  ;;  %2277 = vmatpush3.xpose.msk.msra.mxu1 %vm812_vm2, %v799_v5 }
 0x305   : > { %2271 = vmatprep.subr.mxu0 %v2664_v63  ;;  %2278 = vmatprep.subr.mxu1 %v2664_v63 }
 0x306   : > { %2273 = vmatprep.mubr.msk.f32.mxu0 %vm2665_vm3, %v2664_v63  ;;  %2280 = vmatprep.mubr.msk.f32.mxu1 %vm2665_vm3, %v2664_v63 }
 0x308   : > { %2272 = vmatpush3.xpose.msk.msra.mxu0 %vm812_vm2, %v796_v6  ;;  %2279 = vmatpush3.xpose.msk.msra.mxu1 %vm812_vm2, %v798_v7  ;;  %v1466_v7 = vld [vmem:[%s3225_s13] sm:$0xff]  ;;  %p3234_p8 = scmp.ne.s32.totalorder %s3231_s9, 0 }
 0x309   : > { %2283 = vmatprep.subr.mxu0 %v2664_v63  ;;  %2304 = vmatprep.subr.mxu1 %v2664_v63 }
 0x30b   : > { %2274 = vmatmul.mubr.msk.f32.vlgmr.msra.gmra.mxu0 %vm812_vm2, %v790_v8  ;;  %2281 = vmatmul.mubr.msk.f32.vlgmr.msra.gmra.mxu1 %vm812_vm2, %v791_v9  ;;  %v1467_v8 = vld [vmem:[%s3225_s13 + $0x8] sm:$0xff]  ;;  %v1468_v9 = vld [vmem:[%s3225_s13 + $0x10] sm:$0xff] }
 0x30c   : > { %2287 = vmatprep.mubr.msk.f32.mxu0 %vm2665_vm3, %v2664_v63  ;;  %2308 = vmatprep.mubr.msk.f32.mxu1 %vm2665_vm3, %v2664_v63 }
 0x30d   : > { %2284 = vmatpush3.msra.mxu0 %v801_v50  ;;  %2305 = vmatpush3.msra.mxu1 %v807_v52  ;;  %v2180_v52 = vld [vmem:[%s3227_s6] ss:$0 sm:$0xff]  ;;  %s2027_s6 = sshll.u32 %s2897_s26, 4  ;;  %s2028_s6 = int_to_ptr.vmem [resolvable:$true] %s2027_s6 }
 0x30e   : > { %2285 = vmatprep.subr.mxu0 %v2664_v63  ;;  %2306 = vmatprep.subr.mxu1 %v2664_v63  ;;  %p2553_p13 = scmp.lt.s32.totalorder %s2028_s6, %s2551_s8 }
 0x30f   : > { %2286 = vmatpush3.msra.mxu0 %v800_v51  ;;  %2307 = vmatpush3.msra.mxu1 %v806_v53 }
 0x310   : > { %2290 = vmatprep.subr.mxu0 %v2664_v63  ;;  %2316 = vmatprep.subr.mxu1 %v2664_v63 }
 0x3c3   : > { %v888_v12 = vpop.f32.mrf.mxu0  ;;  %v967_v13 = vpop.f32.mrf.mxu1 }
 0x3c4   : > { %v889_v14 = vadd.f32 %v888_v12, %v808_v10  ;;  %v968_v15 = vadd.f32 %v967_v13, %v809_v11  ;;  %v1469_v12 = vld [vmem:[%s3225_s13 + $0x18] sm:$0xff] }
 0x3c5   : > { %v2261_v16 = vpop.f32.mrf.mxu0  ;;  %v2268_v17 = vpop.f32.mrf.mxu1 }
 0x3c6   : > { %v1130_v18 = vsel %vm1129_vm4, %v889_v14, -inf  ;;  %v1133_v19 = vsel %vm1129_vm4, %v968_v15, -inf }
 0x3c7   : > { %1131 = vmax.xlane.f32.xlu0 %v1130_v18 }
 0x3cb   : > { %1134 = vmax.xlane.f32.xlu0 %v1133_v19  ;;  %v1046_v22 = vpop.f32.mrf.mxu0  ;;  %v1125_v23 = vpop.f32.mrf.mxu1 }
 0x3cc   : > { %v1047_v24 = vadd.f32 %v1046_v22, %v810_v20  ;;  %v1126_v25 = vadd.f32 %v1125_v23, %v811_v21 }
 0x3cd   : > { %v2275_v26 = vpop.f32.mrf.mxu0  ;;  %v2282_v27 = vpop.f32.mrf.mxu1 }
 0x3ce   : > { %v1136_v28 = vsel %vm1129_vm4, %v1047_v24, -inf  ;;  %v1139_v29 = vsel %vm1129_vm4, %v1126_v25, -inf }
 0x3cf   : > { %1137 = vmax.xlane.f32.xlu1 %v1136_v28 }
 0x3d3   : > { %1140 = vmax.xlane.f32.xlu1 %v1139_v29 }
 0x450   : > { %v1132_v30 = vpop.xlane.xlu0 %1131 }
 0x451   : > { %v1142_v31 = vsub.f32 %v889_v14, %v1132_v30 }
 0x453   : > { %v1146_v32 = vmul.f32 1.442695, %v1142_v31 }
 0x454   : > { %v1135_v33 = vpop.xlane.xlu0 %1134 }
 0x455   : > { %2470 = vpow2.f32 %v1146_v32  ;;  %v1143_v34 = vsub.f32 %v968_v15, %v1135_v33  ;;  %v2179_v32 = vld [vmem:[%s3226_s28] ss:$0 sm:$0xff] }
 0x457   : > { %v1148_v35 = vmul.f32 1.442695, %v1143_v34 }
 0x458   : > { %v1138_v36 = vpop.xlane.xlu1 %1137 }
 0x459   : > { %2472 = vpow2.f32 %v1148_v35  ;;  %v1144_v37 = vsub.f32 %v1047_v24, %v1138_v36  ;;  %v786_v35 = vld [vmem:[%s785_s11] sm:$0xff]  ;;  %s2187_s11 = sshll.u32 %s2634_s17, 1  ;;  %s2012_s17 = scalar_lea.sflag [#allocation7], %s2875_s18 }
 0x45a   : > { %s2023_s22 = sadd.s32 %s2630_s16, %s2187_s11  ;;  %s2546_s16 = scalar_lea.vmem %s2028_s6, 128 }
 0x45b   : > { %v1150_v38 = vmul.f32 1.442695, %v1144_v37  ;;  %s2188_s5 = sshll.u32 %s2023_s22, 7  ;;  %p2547_p3 = scmp.ne.s32.totalorder %s2028_s6, %s2546_s16 }
 0x45c   : > { %v1141_v39 = vpop.xlane.xlu1 %1140 }
 0x45d   : > { %2474 = vpow2.f32 %v1150_v38  ;;  %v1145_v40 = vsub.f32 %v1126_v25, %v1141_v39  ;;  %p2548_p9 = pnand %p2547_p3, %p3234_p8 }
 0x45f   : > { %v1152_v41 = vmul.f32 1.442695, %v1145_v40  ;;  %p2549_p12 = pneg %p2548_p9 }
 0x461   : > { %2476 = vpow2.f32 %v1152_v41 }
 0x462   : > { %v2471_v42 = vpop.eup %2470 }
 0x463   : > { %v1154_v43 = vsel %vm1129_vm4, %v2471_v42, 0.0 }
 0x464   : > { %1155 = vadd.xlane.f32.xlu0 %v1154_v43 }
 0x466   : > { %v2473_v44 = vpop.eup %2472 }
 0x467   : > { %v1157_v45 = vsel %vm1129_vm4, %v2473_v44, 0.0 }
 0x468   : > { %1158 = vadd.xlane.f32.xlu1 %v1157_v45  ;;  %v1811_v45 = vld [vmem:[#allocation8 + $0x10] sm:$0xff] }
 0x46a   : > { %v2475_v46 = vpop.eup %2474 }
 0x46b   : > { %v1160_v47 = vsel %vm1129_vm4, %v2475_v46, 0.0 }
 0x46c   : > { %1161 = vadd.xlane.f32.xlu0 %v1160_v47  ;;  %v1809_v47 = vld [vmem:[#allocation8] sm:$0xff] }
 0x46e   : > { %v2477_v48 = vpop.eup %2476 }
 0x46f   : > { %v1163_v49 = vsel %vm1129_vm4, %v2477_v48, 0.0 }
 0x470   : > { %1164 = vadd.xlane.f32.xlu1 %v1163_v49 }
 0x4ed   : > { %v1156_v54 = vpop.xlane.xlu0 %1155 }
 0x4ee   : > { %2478 = vrcp.f32 %v1156_v54  ;;  %v2181_v54 = vld [vmem:[%s3228_s21] ss:$0 sm:$0xff]  ;;  %s3233_s21 = sld [smem:[#allocation29_spill]] }
 0x4f1   : > { %v1159_v55 = vpop.xlane.xlu1 %1158 }
 0x4f2   : > { %2480 = vrcp.f32 %v1159_v55 }
 0x4f4   : > { %s2025_s24 = scalar_lea.hbm %s3233_s21, %s2188_s5 }
 0x4f5   : > { %v1162_v56 = vpop.xlane.xlu0 %1161 }
 0x4f6   : > { %2482 = vrcp.f32 %v1162_v56 }
 0x4f9   : > { %v1165_v57 = vpop.xlane.xlu1 %1164 }
 0x4fa   : > { %2484 = vrcp.f32 %v1165_v57  ;;  %v1927_v57 = vld [vmem:[%s3229_s12 + $0x38] sm:$0xff] }
 0x4fb   : > { %v2479_v58 = vpop.eup %2478 }
 0x4fc   : > { %v1170_v59 = vmul.f32 %v2479_v58, %v2471_v42  ;;  %v1926_v58 = vld [vmem:[%s3229_s12 + $0x30] sm:$0xff] }
 0x4fe   : > { %2288 = vmatmul.mubr.msk.f32.vlgmr.msra.gmra.mxu0 %vm1129_vm4, %v1170_v59  ;;  %v1925_v59 = vld [vmem:[%s3229_s12 + $0x28] sm:$0xff] }
 0x4ff   : > { %v2481_v62 = vpop.eup %2480  ;;  %2291 = vmatpush3.msra.mxu0 %v803_v60  ;;  %2294 = vmatprep.mubr.msk.f32.mxu0 %vm2665_vm3, %v2664_v63  ;;  %v1924_v60 = vld [vmem:[%s3229_s12 + $0x20] sm:$0xff] }
 0x500   : > { %2292 = vmatprep.subr.mxu0 %v2664_v63  ;;  %v1171_v0 = vmul.f32 %v2481_v62, %v2473_v44  ;;  %v1812_v44 = vld [vmem:[#allocation8 + $0x18] sm:$0xff]  ;;  %v1922_v62 = vld [vmem:[%s3229_s12 + $0x10] sm:$0xff] }
 0x501   : > { %2293 = vmatpush3.msra.mxu0 %v802_v61  ;;  %v1923_v61 = vld [vmem:[%s3229_s12 + $0x18] sm:$0xff] }
 0x502   : > { %2295 = vmatmul.mubr.msk.f32.vlgmr.msra.gmra.mxu0 %vm1129_vm4, %v1171_v0  ;;  %2297 = vmatprep.subr.mxu0 %v2664_v63  ;;  %v1921_v0 = vld [vmem:[%s3229_s12 + $0x8] sm:$0xff] }
 0x503   : > { %v2483_v3 = vpop.eup %2482  ;;  %2298 = vmatpush3.msra.mxu0 %v805_v1  ;;  %2301 = vmatprep.mubr.msk.f32.mxu0 %vm2665_vm3, %v2664_v63  ;;  %v1920_v1 = vld [vmem:[%s3229_s12] sm:$0xff] }
 0x504   : > { %2299 = vmatprep.subr.mxu0 %v2664_v63  ;;  %v1172_v4 = vmul.f32 %v2483_v3, %v2475_v46  ;;  %v1810_v46 = vld [vmem:[#allocation8 + $0x8] sm:$0xff] }
 0x505   : > { %2300 = vmatpush3.msra.mxu0 %v804_v2  ;;  %v2182_v2 = vld [vmem:[%s3230_s10] ss:$0 sm:$0xff]  ;;  %s2552_s10 = scalar_lea.vmem %s2551_s8, 256 }
 0x506   : > { %2302 = vmatmul.mubr.msk.f32.vlgmr.msra.gmra.mxu0 %vm1129_vm4, %v1172_v4  ;;  %2311 = vmatprep.subr.mxu0 %v2664_v63  ;;  %p2554_p0 = scmp.lt.s32.totalorder %s2552_s10, %s2546_s16 }
 0x507   : > { %v2485_v5 = vpop.eup %2484  ;;  %2313 = vmatprep.mubr.msk.f32.mxu0 %vm2665_vm3, %v2664_v63  ;;  %2312 = vmatpush3.msra.mxu0 %v1466_v7 }
 0x508   : > { %v1173_v6 = vmul.f32 %v2485_v5, %v2477_v48  ;;  %2321 = vmatprep.subr.mxu0 %v2664_v63  ;;  %p2555_p1 = por %p2554_p0, %p2553_p13 }
 0x50a   : > { %2309 = vmatmul.mubr.msk.f32.vlgmr.msra.gmra.mxu1 %vm1129_vm4, %v1173_v6  ;;  %p2556_p4 = pnand %p2555_p1, %p2549_p12 }
 0x50b   : > { %2318 = vmatprep.mubr.msk.f32.mxu1 %vm2665_vm3, %v2664_v63  ;;  %2317 = vmatpush3.msra.mxu1 %v1467_v8 }
 0x50c   : > { %2326 = vmatprep.subr.mxu1 %v2664_v63 }
 0x5be   : > { %v1243_v10 = vpop.f32.mrf.mxu0 }
 0x5bf   : > { %2314 = vmatmul.mubr.msk.f32.vlgmr.msra.gmra.mxu0 %vm812_vm2, %v1243_v10 }
 0x5c0   : > { %v2289_v11 = vpop.f32.mrf.mxu0  ;;  %2322 = vmatpush3.msra.mxu0 %v1468_v9  ;;  %2323 = vmatprep.mubr.msk.f32.mxu0 %vm2665_vm3, %v2664_v63 }
 0x5c1   : > { %2331 = vmatprep.subr.mxu0 %v2664_v63 }
 0x5c2   : > { %v1316_v13 = vpop.f32.mrf.mxu0 }
 0x5c3   : > { %2319 = vmatmul.mubr.msk.f32.vlgmr.msra.gmra.mxu1 %vm812_vm2, %v1316_v13 }
 0x5c4   : > { %v2296_v14 = vpop.f32.mrf.mxu0  ;;  %2327 = vmatpush3.msra.mxu1 %v1469_v12  ;;  %2328 = vmatprep.mubr.msk.f32.mxu1 %vm2665_vm3, %v2664_v63 }
 0x5c5   : > { %2342 = vmatprep.subr.mxu1 %v2664_v63 }
 0x5c6   : > { %v1389_v15 = vpop.f32.mrf.mxu0 }
 0x5c7   : > { %2324 = vmatmul.mubr.msk.f32.vlgmr.msra.gmra.mxu0 %vm812_vm2, %v1389_v15 }
 0x5c8   : > { %v2303_v16 = vpop.f32.mrf.mxu0  ;;  %2339 = vmatprep.mubr.msk.f32.mxu0 %vm2665_vm3, %v2664_v63  ;;  %2332 = vmatpush3.msra.mxu0 %v1812_v44 }
 0x5c9   : > { %2333 = vmatprep.subr.mxu0 %v2664_v63 }
 0x5ca   : > { %v1462_v17 = vpop.f32.mrf.mxu1  ;;  %2334 = vmatpush3.msra.mxu0 %v1811_v45 }
 0x5cb   : > { %2329 = vmatmul.mubr.msk.f32.vlgmr.msra.gmra.mxu1 %vm812_vm2, %v1462_v17  ;;  %2335 = vmatprep.subr.mxu0 %v2664_v63 }
 0x5cc   : > { %v2310_v18 = vpop.f32.mrf.mxu1  ;;  %2358 = vmatprep.mubr.msk.f32.mxu1 %vm2665_vm3, %v2664_v63  ;;  %2336 = vmatpush3.msra.mxu0 %v1810_v46 }
 0x5cd   : > { %2337 = vmatprep.subr.mxu0 %v2664_v63  ;;  %2343 = vmatpush3.msra.mxu1 %v1927_v57 }
 0x5ce   : > { %2338 = vmatpush3.msra.mxu0 %v1809_v47  ;;  %2344 = vmatprep.subr.mxu1 %v2664_v63 }
 0x5cf   : > { %2345 = vmatpush3.msra.mxu1 %v1926_v58 }
 0x5d0   : > { %2346 = vmatprep.subr.mxu1 %v2664_v63 }
 0x5d1   : > { %2347 = vmatpush3.msra.mxu1 %v1925_v59 }
 0x5d2   : > { %2348 = vmatprep.subr.mxu1 %v2664_v63 }
 0x5d3   : > { %2349 = vmatpush3.msra.mxu1 %v1924_v60 }
 0x5d4   : > { %2350 = vmatprep.subr.mxu1 %v2664_v63 }
 0x5d5   : > { %2351 = vmatpush3.msra.mxu1 %v1923_v61 }
 0x5d6   : > { %2352 = vmatprep.subr.mxu1 %v2664_v63 }
 0x5d7   : > { %2353 = vmatpush3.msra.mxu1 %v1922_v62 }
 0x5d8   : > { %2354 = vmatprep.subr.mxu1 %v2664_v63 }
 0x5d9   : > { %2355 = vmatpush3.msra.mxu1 %v1921_v0 }
 0x5da   : > { %2356 = vmatprep.subr.mxu1 %v2664_v63 }
 0x5db   : > { %2357 = vmatpush3.msra.mxu1 %v1920_v1 }
 0x67f   : > { %v1539_v19 = vpop.f32.mrf.mxu0 }
 0x680   : > { %v1763_v25 = vsel %vm1762_vm5, %v1539_v19, 0.0 }
 0x681   : > { %v2315_v20 = vpop.f32.mrf.mxu0 }
 0x683   : > { %v1612_v21 = vpop.f32.mrf.mxu1 }
 0x684   : > { %v1764_v23 = vsel %vm1762_vm5, %v1612_v21, 0.0 }
 0x685   : > { %v2320_v22 = vpop.f32.mrf.mxu1  ;;  %v1765_v27 = vadd.f32 %v1764_v23, %v1763_v25 }
 0x687   : > { %v1685_v24 = vpop.f32.mrf.mxu0 }
 0x688   : > { %v1766_v26 = vsel %vm1762_vm5, %v1685_v24, 0.0 }
 0x689   : > { %v2325_v28 = vpop.f32.mrf.mxu0  ;;  %v1767_v29 = vadd.f32 %v1766_v26, %v1765_v27 }
 0x68b   : > { %v1758_v30 = vpop.f32.mrf.mxu1 }
 0x68c   : > { %v1768_v31 = vsel %vm1762_vm5, %v1758_v30, 0.0  ;;  %v2184_v30 = vld [vmem:[%s3232_s20] ss:$0 sm:$0xff] }
 0x68d   : > { %v1769_v33 = vadd.f32 %v1768_v31, %v1767_v29  ;;  %v2330_v34 = vpop.f32.mrf.mxu1 }
 0x68f   : > { %v1777_v36 = vadd.f32 %v2179_v32, %v1769_v33 }
 0x691   : > { %v3060_v37 = vadd.f32 %v1777_v36, %v786_v35 }
 0x693   : > { %v1781_v38 = vsel %vm1762_vm5, %v3060_v37, 0.0 }
 0x694   : > { %1782 = vadd.xlane.f32.xlu0 %v1781_v38 }
 0x71d   : > { %v1783_v39 = vpop.xlane.xlu0 %1782 }
 0x71e   : > { %v1785_v40 = vmul.f32 0.03125, %v1783_v39 }
 0x720   : > { %v1786_v41 = vsub.f32 %v3060_v37, %v1785_v40 }
 0x722   : > { %v1787_v42 = vmul.f32 %v1786_v41, %v1786_v41 }
 0x724   : > { %v1788_v43 = vsel %vm1762_vm5, %v1787_v42, 0.0 }
 0x725   : > { %1789 = vadd.xlane.f32.xlu1 %v1788_v43 }
 0x7ae   : > { %v1790_v48 = vpop.xlane.xlu1 %1789 }
 0x7af   : > { %v1791_v49 = vmul.f32 0.03125, %v1790_v48 }
 0x7b1   : > { %v1792_v50 = vadd.f32 1e-05, %v1791_v49 }
 0x7b3   : > { %2486 = vrsqrt.f32 %v1792_v50 }
 0x7c0   : > { %v2487_v51 = vpop.eup %2486 }
 0x7c1   : > { %v1794_v53 = vmul.f32 %v2487_v51, %v1786_v41 }
 0x7c3   : > { %v1801_v55 = vmul.f32 %v2180_v52, %v1794_v53 }
 0x7c5   : > { %v1808_v56 = vadd.f32 %v2181_v54, %v1801_v55 }
 0x7c7   : > { %2340 = vmatmul.mubr.msk.f32.vlgmr.msra.gmra.mxu0 %vm1762_vm5, %v1808_v56 }
 0x887   : > { %v1889_v3 = vpop.f32.mrf.mxu0 }
 0x888   : > { %v1890_v4 = vadd.f32 %v2182_v2, %v1889_v3 }
 0x889   : > { %v2341_v5 = vpop.f32.mrf.mxu0 }
 0x88a   : > { %v1894_v6 = vmul.f32 0.70710677, %v1890_v4  ;;  %v1893_v27 = vmul.f32 0.5, %v1890_v4 }
 0x88c   : > { %v1895_v7 = vand.u32 2147483647, %v1894_v6  ;;  %vm1915_vm6 = vcmp.ge.f32.partialorder %v1894_v6, 0.0 }
 0x88e   : > { %v1896_v8 = vmul.f32 0.3275911, %v1895_v7  ;;  %v1909_v10 = vsub.f32 0.0, %v1895_v7 }
 0x890   : > { %v1897_v9 = vadd.f32 1.0, %v1896_v8  ;;  %v1910_v11 = vmul.f32 %v1909_v10, %v1895_v7 }
 0x892   : > { %2488 = vrcp.f32 %v1897_v9  ;;  %v1911_v13 = vmul.f32 1.442695, %v1910_v11 }
 0x894   : > { %2490 = vpow2.f32 %v1911_v13 }
 0x89f   : > { %v2489_v63 = vpop.eup %2488 }
 0x8a0   : > { %v1900_v12 = vmul.f32 1.0614054, %v2489_v63 }
 0x8a1   : > { %v2491_v22 = vpop.eup %2490 }
 0x8a2   : > { %v1901_v14 = vadd.f32 -1.4531521, %v1900_v12 }
 0x8a4   : > { %v1902_v15 = vmul.f32 %v2489_v63, %v1901_v14 }
 0x8a6   : > { %v1903_v16 = vadd.f32 1.4214138, %v1902_v15 }
 0x8a8   : > { %v1904_v17 = vmul.f32 %v2489_v63, %v1903_v16 }
 0x8aa   : > { %v1905_v18 = vadd.f32 -0.28449672, %v1904_v17 }
 0x8ac   : > { %v1906_v19 = vmul.f32 %v2489_v63, %v1905_v18 }
 0x8ae   : > { %v1907_v20 = vadd.f32 0.2548296, %v1906_v19 }
 0x8b0   : > { %v1908_v21 = vmul.f32 %v2489_v63, %v1907_v20 }
 0x8b2   : > { %v1913_v23 = vmul.f32 %v2491_v22, %v1908_v21 }
 0x8b4   : > { %v1914_v24 = vsub.f32 1.0, %v1913_v23 }
 0x8b6   : > { %v1916_v25 = vsub.f32 0.0, %v1914_v24 }
 0x8b8   : > { %v1917_v26 = vsel %vm1915_vm6, %v1914_v24, %v1916_v25 }
 0x8b9   : > { %v1918_v28 = vadd.f32 1.0, %v1917_v26 }
 0x8bb   : > { %v1919_v29 = vmul.f32 %v1918_v28, %v1893_v27 }
 0x8bd   : > { %2359 = vmatmul.mubr.msk.f32.vlgmr.msra.gmra.mxu1 %vm1935_vm7, %v1919_v29 }
 0x97d   : > { %v2005_v31 = vpop.f32.mrf.mxu1 }
 0x97e   : > { %v2006_v32 = vadd.f32 %v2184_v30, %v2005_v31 }
 0x97f   : > { %v2360_v33 = vpop.f32.mrf.mxu1 }
 0x980   : > { %v2009_v34 = vadd.f32 %v2006_v32, %v3060_v37 }
 0x982   : > { %2010 = vst.msk [vmem:[%s2897_s26] sm:$0xff] %vm1762_vm5, %v2009_v34 }
 0x983   : > { %2559 = shalt.err (!%p2556_p4)
}
 0x984   : > { %s2560_s11 = scalar_lea.hbm %s2025_s24, 128  ;;  %s2564_s22 = scalar_lea.hbm %s3233_s21, 512 }
 0x985   : > { %p2561_p6 = scmp.ne.s32.totalorder %s2025_s24, %s2560_s11  ;;  %p2565_p5 = scmp.lt.s32.totalorder %s2025_s24, %s3233_s21 }
 0x986   : > { %p2566_p2 = scmp.lt.s32.totalorder %s2564_s22, %s2560_s11 }
 0x987   : > { %p2562_p10 = pnand %p2561_p6, %p3234_p8 }
 0x988   : > { %p2567_p7 = por %p2566_p2, %p2565_p5 }
 0x989   : > { %p2563_p11 = pneg %p2562_p10 }
 0x98b   : > { %p2568_p3 = pnand %p2567_p7, %p2563_p11 }
 0x98d   : > { %2571 = shalt.err (!%p2568_p3)
}
 0x98e   : > { %2367 = dma.vmem_to_hbm [thread:$0]  (%p3234_p8), %s2028_s6, 128, %s2025_s24, %s2012_s17  }
 0x98f PF: > { %s3235_s20 = sld [smem:[#allocation16_spill]] }
 0x990   : > { %s3236_s5 = sld [smem:[#allocation14_spill]] }
 0x991   : > { %s3237_s7 = sld [smem:[#allocation18_spill]] }
 0x995   : > { %p2384_p9 = scmp.ge.s32.totalorder %s3235_s20, 2 }
 0x996   : > { %s2039_s29 = sand.u32 1, %s3236_s5  }
 0x997   : > { %p3238_p12 = scmp.ne.s32.totalorder %s3237_s7, 0  ;;  %s2040_s16 = scalar_lea.sflag [#allocation7], %s2039_s29 }
 0x999   : > { %p2378_p13 = pnand %p2384_p9, %p3238_p12 }
 0x99b   : > { %p2379_p0 = pneg %p2378_p13 }
 0x99d   : > { %2613 = dma.done.wait (%p2379_p0), %s2040_s16, 128  }
 0x99e   : > { %2615 = vsyncadd (%p2379_p0), %s2040_s16, 4294967168  ;;  %s31_s20 = sadd.s32 1, %s3235_s20   ;;  %s3239_s16 = sld [smem:[#allocation15_spill]] }
 0x99f   : > { %p28_p1 = scmp.ge.s32.totalorder %s31_s20, 6   ;;  %s3240_s18 = sld [smem:[#allocation19_spill]] }
 0x9a0   : > { %s3241_s29 = smov %s2622_s30  ;;  %s3242_s30 = smov %s2626_s15 }
 0x9a1   : > { %s3243_s15 = smov %s2870_s25  ;;  %s3244_s17 = smov %s2642_s19 }
 0x9a2   : > { %s3245_s19 = smov %s3251_s27  ;;  %30 = sbr.rel (!%p28_p1) target bundleno = 19 (0x13), region = 143 }
 0x9a7   :  { %2045 = vsyncpa [#allocation6], 1 }
 0x9a8   :  { %2047 = vsyncpa [#allocation6 + $0x1], 1 }
 0x9a9   :  { %2048 = vsyncpa [#allocation9], 1 }
 0x9aa   :  { %2049 = vsyncpa [#allocation7], 1 }
 0x9ab   :  { %2051 = vsyncpa [#allocation7 + $0x1], 1 }

</bundles_post_ra>
